<compile_context>
chip_gen: v7x
topology: tpu7x:2x2x1
jax: 0.10.0
libtpu: 0.0.40
codegen_flags: <defaults>
</compile_context>

<pallas_src>
import functools

import jax
import jax.numpy as jnp
from jax import lax
from jax.experimental import pallas as pl
from jax.experimental.pallas import tpu as pltpu

EPS = 1e-6
LANES = 128
# Single-block cap (elements). Keeps inputs + f32 in-kernel temporaries a few
# MiB — comfortably inside v7x's 32 MiB default scoped-VMEM limit.
SINGLE_BLOCK_MAX_ELEMS = 256 * 1024


def _elementwise_weighted(p, t, *, neg_w1, neg_w0, binary_truth):
    """weighted = (t*log(p+eps) + (1-t)*log(1-p+eps)) * (-(0.98*t + 0.02)/n)."""
    if binary_truth:
        # Single EUP log per element; exact only when truth is a {0,1} mask.
        term = jnp.log(jnp.where(t >= 0.5, p, 1.0 - p) + EPS)
    else:
        l1 = jnp.log(p + EPS)          # log(p + eps)       (EUP)
        l0 = jnp.log(1.0 - p + EPS)    # log(1 - p + eps)   (EUP)
        term = l0 + t * (l1 - l0)      # == t*l1 + (1-t)*l0
    # -(0.98*t + 0.02)/n  folded into two constants.
    return term * (t * neg_w1 + neg_w0)


def _myloss_single_kernel(p_ref, t_ref, out_ref, *, neg_w1, neg_w0, binary_truth):
    # In-kernel cast: inputs arrive in their native (possibly narrow) dtype.
    p = p_ref[...].astype(jnp.float32)
    t = t_ref[...].astype(jnp.float32)
    weighted = _elementwise_weighted(
        p, t, neg_w1=neg_w1, neg_w0=neg_w0, binary_truth=binary_truth)
    # Scalar result to SMEM (no masked 1-lane VMEM store).
    out_ref[0, 0] = jnp.sum(weighted)


def _myloss_tiled_kernel(p_ref, t_ref, out_ref, *, neg_w1, neg_w0,
                         binary_truth, n_valid, tile_rows):
    k = pl.program_id(1)

    @pl.when(k == 0)
    def _():
        out_ref[...] = jnp.zeros_like(out_ref)

    p = p_ref[...].astype(jnp.float32)
    t = t_ref[...].astype(jnp.float32)
    weighted = _elementwise_weighted(
        p, t, neg_w1=neg_w1, neg_w0=neg_w0, binary_truth=binary_truth)

    if n_valid is not None:
        # Only taken when the grid over-covers the array (ragged / uneven
        # split): zero contributions whose *nominal* flat index is past the
        # true element count.  Handles partially-OOB tiles (unspecified data)
        # and index-map-clamped duplicate tiles alike (jnp.where is a select,
        # so NaN/Inf garbage in the masked region is harmless).
        base = (pl.program_id(0) * pl.num_programs(1) + k) * (tile_rows * LANES)
        rows, lanes = weighted.shape
        row_idx = lax.broadcasted_iota(jnp.int32, (rows, lanes), 0)
        lane_idx = lax.broadcasted_iota(jnp.int32, (rows, lanes), 1)
        flat_idx = base + row_idx * lanes + lane_idx
        weighted = jnp.where(flat_idx < n_valid, weighted, 0.0)

    # Per-lane f32 partial sums, accumulated in the resident output block.
    out_ref[...] += jnp.sum(weighted, axis=0, keepdims=True)


def my_loss(predict, truth, beta=50.0, *, binary_truth=False,
            tile_rows=2048, force_tiled=False):
    """predict, truth: arrays of identical total size (e.g. (1, 224, 224)),
    values in [0, 1].  predict may be f32/bf16/f16; truth may be any float
    dtype, or int8/bool when it is a {0,1} mask (pass binary_truth=True to
    enable the single-log fast path, which is only exact for binary truth).
    Returns a scalar f32 loss.  `beta` is unused in the reference forward
    pass (kept for signature parity)."""
    del beta
    p = predict.reshape(-1)   # metadata-only reshapes; NO wrapper-side casts
    t = truth.reshape(-1)
    n = p.shape[0]
    inv_n = 1.0 / n
    neg_w1 = -0.98 * inv_n    # fold the leading minus and 1/n into the weight
    neg_w0 = -0.02 * inv_n

    if n <= SINGLE_BLOCK_MAX_ELEMS and not force_tiled:
        # ---------------- single-block path (no grid) ----------------
        if n % LANES == 0:
            p2 = p.reshape(n // LANES, LANES)
            t2 = t.reshape(n // LANES, LANES)
        else:
            # Full-extent (1, n) block: no jnp.pad HBM copy, no in-kernel
            # mask — Mosaic masks the partial vregs internally.
            p2 = p.reshape(1, n)
            t2 = t.reshape(1, n)
        kernel = functools.partial(
            _myloss_single_kernel,
            neg_w1=neg_w1, neg_w0=neg_w0, binary_truth=binary_truth)
        out = pl.pallas_call(
            kernel,
            out_shape=jax.ShapeDtypeStruct((1, 1), jnp.float32),
            in_specs=[
                pl.BlockSpec(p2.shape, lambda: (0, 0)),
                pl.BlockSpec(t2.shape, lambda: (0, 0)),
            ],
            out_specs=pl.BlockSpec(memory_space=pltpu.MemorySpace.SMEM),
        )(p2, t2)
        return out[0, 0]

    # ---------------- large-N tiled path (v7x-aware) ----------------
    if n % LANES != 0:
        # Corner case (huge AND ragged): pad only to the next lane multiple;
        # the padded tail is masked in-kernel via n_valid, divisor stays n.
        pad = LANES - n % LANES
        p = jnp.pad(p, (0, pad))
        t = jnp.pad(t, (0, pad))
    rows = p.shape[0] // LANES
    p2 = p.reshape(rows, LANES)
    t2 = t.reshape(rows, LANES)

    # Leading "parallel" axis of 2 -> both v7x TensorCores stream half the
    # rows (harmless no-op on single-TC v5e/v6e).
    num_par = 2 if rows >= 2 * tile_rows else 1
    rows_per_p = pl.cdiv(rows, num_par)
    k_steps = pl.cdiv(rows_per_p, tile_rows)
    covered = num_par * k_steps * tile_rows * LANES
    n_valid = n if covered != n else None
    # Last block index that still overlaps the array; clamp nominal indices so
    # no block starts fully out of bounds (duplicates are masked via n_valid).
    max_blk = pl.cdiv(rows, tile_rows) - 1

    def in_map(pp, kk):
        return (jnp.minimum(pp * k_steps + kk, max_blk), 0)

    kernel = functools.partial(
        _myloss_tiled_kernel,
        neg_w1=neg_w1, neg_w0=neg_w0, binary_truth=binary_truth,
        n_valid=n_valid, tile_rows=tile_rows)

    partials = pl.pallas_call(
        kernel,
        out_shape=jax.ShapeDtypeStruct((num_par, LANES), jnp.float32),
        grid_spec=pltpu.PrefetchScalarGridSpec(
            num_scalar_prefetch=0,
            grid=(num_par, k_steps),
            in_specs=[
                pl.BlockSpec((tile_rows, LANES), in_map),
                pl.BlockSpec((tile_rows, LANES), in_map),
            ],
            out_specs=pl.BlockSpec((1, LANES), lambda pp, kk: (pp, 0)),
        ),
        compiler_params=pltpu.CompilerParams(
            dimension_semantics=("parallel", "arbitrary"),
            vmem_limit_bytes=32 * 1024 * 1024,
        ),
    )(p2, t2)
    # Tiny (num_par, 128) f32 reduce; -1/n already folded per element.
    return jnp.sum(partials)


def _reference_loss(predict, truth):
    t = truth.reshape(-1).astype(jnp.float32)
    p = predict.reshape(-1).astype(jnp.float32)
    w = t * 0.98 + 0.02
    return -jnp.mean((t * jnp.log(p + EPS) + (1.0 - t) * jnp.log(1.0 - p + EPS)) * w)


def _check(name, got, want, rtol=5e-4, atol=1e-5):
    assert jnp.allclose(got, want, rtol=rtol, atol=atol), (name, got, want)


if __name__ == "__main__":
    key = jax.random.PRNGKey(0)
    keys = jax.random.split(key, 12)

    # 1) Canonical 1x224x224, general (continuous-truth) path, native bf16
    #    predict + bf16 truth (narrow truth dtype -> half the truth HBM bytes).
    shape = (1, 224, 224)
    predict = jax.random.uniform(
        keys[0], shape, dtype=jnp.float32, minval=0.01, maxval=0.99
    ).astype(jnp.bfloat16)
    truth = jax.random.uniform(keys[1], shape, dtype=jnp.float32).astype(jnp.bfloat16)
    loss = jax.block_until_ready(my_loss(predict, truth))
    _check("canonical", loss, _reference_loss(predict, truth))

    # 2) Ragged size (not a multiple of 128): full-extent (1, n) block,
    #    no wrapper jnp.pad, no in-kernel mask.
    shape2 = (1, 20, 20)
    predict2 = jax.random.uniform(keys[2], shape2, dtype=jnp.float32,
                                  minval=0.01, maxval=0.99)
    truth2 = jax.random.uniform(keys[3], shape2, dtype=jnp.float32).astype(jnp.bfloat16)
    loss2 = jax.block_until_ready(my_loss(predict2, truth2))
    _check("ragged", loss2, _reference_loss(predict2, truth2))

    # 3) Binary-truth fast path (single log/elem) with int8 {0,1} truth.
    truth3 = (jax.random.uniform(keys[4], shape, dtype=jnp.float32) > 0.5
              ).astype(jnp.int8)
    loss3 = jax.block_until_ready(my_loss(predict, truth3, binary_truth=True))
    _check("binary_int8", loss3, _reference_loss(predict, truth3))

    # 4) Tiled (parallel, arbitrary) path, exact tiling (no mask), both
    #    "cores" worth of partial sums combined in the wrapper.
    shape4 = (1, 256, 256)
    predict4 = jax.random.uniform(keys[5], shape4, dtype=jnp.float32,
                                  minval=0.01, maxval=0.99).astype(jnp.bfloat16)
    truth4 = jax.random.uniform(keys[6], shape4, dtype=jnp.float32).astype(jnp.bfloat16)
    loss4 = jax.block_until_ready(
        my_loss(predict4, truth4, force_tiled=True, tile_rows=128))
    _check("tiled_exact", loss4, _reference_loss(predict4, truth4))

    # 5) Tiled path with a partially out-of-bounds last tile (masked).
    loss5 = jax.block_until_ready(
        my_loss(predict, truth, force_tiled=True, tile_rows=128))
    _check("tiled_masked", loss5, _reference_loss(predict, truth))

    # 6) Tiled path where the nominal block index is clamped (uneven split
    #    across the parallel axis) — clamped duplicate tiles fully masked.
    shape6 = (1, 257, 128)
    predict6 = jax.random.uniform(keys[7], shape6, dtype=jnp.float32,
                                  minval=0.01, maxval=0.99).astype(jnp.bfloat16)
    truth6 = jax.random.uniform(keys[8], shape6, dtype=jnp.float32).astype(jnp.bfloat16)
    loss6 = jax.block_until_ready(
        my_loss(predict6, truth6, force_tiled=True, tile_rows=128))
    _check("tiled_clamped", loss6, _reference_loss(predict6, truth6))

    # TODO(synk): `truth.detach().cpu().numpy()` in the PyTorch forward is a
    # dead host-side copy with no effect on the returned loss; intentionally
    # omitted.
    print("KERNEL_OK")
</pallas_src>

<mosaic_0001>
module attributes {stable_mosaic.version = 11 : i64} {
  func.func @_myloss_single_kernel(%arg0: memref<392x128xbf16, #tpu.memory_space<vmem>>, %arg1: memref<392x128xbf16, #tpu.memory_space<vmem>>, %arg2: memref<1x1xf32, #tpu.memory_space<smem>>) attributes {dimension_semantics = [], scalar_prefetch = 0 : i64, scratch_operands = 0 : i64, tpu.core_type = #tpu.core_type<tc>} {
    %c0 = arith.constant 0 : index
    %c0_0 = arith.constant 0 : index
    %0 = vector.load %arg0[%c0, %c0_0] : memref<392x128xbf16, #tpu.memory_space<vmem>>, vector<392x128xbf16>
    %1 = arith.extf %0 : vector<392x128xbf16> to vector<392x128xf32>
    %c0_1 = arith.constant 0 : index
    %c0_2 = arith.constant 0 : index
    %2 = vector.load %arg1[%c0_1, %c0_2] : memref<392x128xbf16, #tpu.memory_space<vmem>>, vector<392x128xbf16>
    %3 = arith.extf %2 : vector<392x128xbf16> to vector<392x128xf32>
    %cst = arith.constant 9.99999997E-7 : f32
    %4 = vector.broadcast %cst : f32 to vector<392x128xf32>
    %5 = arith.addf %1, %4 : vector<392x128xf32>
    %6 = math.log %5 : vector<392x128xf32>
    %cst_3 = arith.constant 1.000000e+00 : f32
    %7 = vector.broadcast %cst_3 : f32 to vector<392x128xf32>
    %8 = arith.subf %7, %1 : vector<392x128xf32>
    %cst_4 = arith.constant 9.99999997E-7 : f32
    %9 = vector.broadcast %cst_4 : f32 to vector<392x128xf32>
    %10 = arith.addf %8, %9 : vector<392x128xf32>
    %11 = math.log %10 : vector<392x128xf32>
    %12 = arith.subf %6, %11 : vector<392x128xf32>
    %13 = arith.mulf %3, %12 : vector<392x128xf32>
    %14 = arith.addf %11, %13 : vector<392x128xf32>
    %cst_5 = arith.constant -1.95312496E-5 : f32
    %15 = vector.broadcast %cst_5 : f32 to vector<392x128xf32>
    %16 = arith.mulf %3, %15 : vector<392x128xf32>
    %cst_6 = arith.constant -3.98596939E-7 : f32
    %17 = vector.broadcast %cst_6 : f32 to vector<392x128xf32>
    %18 = arith.addf %16, %17 : vector<392x128xf32>
    %19 = arith.mulf %14, %18 : vector<392x128xf32>
    %20 = vector.shape_cast %19 : vector<392x128xf32> to vector<1x392x128xf32>
    %cst_7 = arith.constant dense<0.000000e+00> : vector<1xf32>
    %21 = vector.multi_reduction <add>, %20, %cst_7 [1, 2] : vector<1x392x128xf32> to vector<1xf32>
    %22 = vector.shape_cast %21 : vector<1xf32> to vector<1x1x1xf32>
    %23 = vector.extract %22[0, 0, 0] : f32 from vector<1x1x1xf32>
    %c0_8 = arith.constant 0 : index
    %c0_9 = arith.constant 0 : index
    %24 = memref.load %arg2[%c0_8, %c0_9] : memref<1x1xf32, #tpu.memory_space<smem>>
    memref.store %23, %arg2[%c0_8, %c0_9] : memref<1x1xf32, #tpu.memory_space<smem>>
    return
  }
}

</mosaic_0001>

<bundles_post_ra>
// kernel: tpu_custom_call.1
= control target key start
LH: loop header
LB: loop body
LE: loop exit
PB: predicated region body
PF: predicated region fallthrough
CT: control target
= control target key end

     0   :  { %7 = vsyncpa [#allocation3], 0  ;;  %s2820_s0 = inlined_call_operand.hbm [shape: bf16[392,128], index: 0, kind: input, shape index: {}]   ;;  %s2821_s1 = inlined_call_operand.hbm [shape: bf16[392,128], index: 1, kind: input, shape index: {}]   ;;  %s2822_s2 = inlined_call_operand.hbm [shape: f32[1,1], index: 2, kind: output, shape index: {}]  }
   0x1   :  { %8 = vsyncpa [#allocation6], 0 }
   0x2   :  { %9 = vsyncpa [#allocation4], 0  ;;  %s1448_s9 = smov [#allocation2]   ;;  %s1388_s13 = scalar_lea.hbm %s2820_s0, 3136 }
   0x3   :  { %s15_s10 = sshll.u32 %s1448_s9, 4  ;;  %p1389_p0 = scmp.ne.s32.totalorder %s2820_s0, %s1388_s13  ;;  %s16_s10 = int_to_ptr.vmem [resolvable:$true] %s15_s10 }
   0x4   :  { %p1392_p1 = scmp.lt.u32.totalorder %s1388_s13, %s2820_s0 }
   0x6   :  { %p1394_p2 = pnand %p1392_p1, %p1389_p0 }
   0x8   :  { %1397 = shalt.err (!%p1394_p2)
}
   0x9   :  { %s1398_s18 = scalar_lea.vmem %s16_s10, 3136  ;;  %p1403_p4 = scmp.lt.s32.totalorder %s16_s10, %s16_s10 }
   0xa   :  { %p1399_p3 = scmp.ne.s32.totalorder %s16_s10, %s1398_s18  ;;  %p1404_p5 = scmp.lt.s32.totalorder %s1398_s18, %s1398_s18 }
   0xc   :  { %p1405_p6 = por %p1404_p5, %p1403_p4 }
   0xe   :  { %p1406_p7 = pnand %p1405_p6, %p1399_p3 }
  0x10   :  { %1409 = shalt.err (!%p1406_p7)
}
  0x11   :  { %s1449_s19 = smov 64   ;;  %s1450_s20 = smov 4  }
  0x12   :  { %21 = dma.hbm_to_vmem [thread:$0]  %s2820_s0, 3136, %s16_s10, [#allocation3], %s1449_s19, %s1449_s19, %s1450_s20  }
  0x13   :  { %s1451_s23 = smov [#allocation5]   ;;  %s1410_s27 = scalar_lea.hbm %s2821_s1, 3136 }
  0x14   :  { %s27_s24 = sshll.u32 %s1451_s23, 4  ;;  %p1411_p8 = scmp.ne.s32.totalorder %s2821_s1, %s1410_s27  ;;  %s28_s24 = int_to_ptr.vmem [resolvable:$true] %s27_s24 }
  0x15   :  { %p1414_p9 = scmp.lt.u32.totalorder %s1410_s27, %s2821_s1 }
  0x17   :  { %p1416_p10 = pnand %p1414_p9, %p1411_p8 }
  0x19   :  { %1419 = shalt.err (!%p1416_p10)
}
  0x1a   :  { %s1420_s4 = scalar_lea.vmem %s28_s24, 3136  ;;  %p1425_p12 = scmp.lt.s32.totalorder %s28_s24, %s28_s24 }
  0x1b   :  { %p1421_p11 = scmp.ne.s32.totalorder %s28_s24, %s1420_s4  ;;  %p1426_p13 = scmp.lt.s32.totalorder %s1420_s4, %s1420_s4 }
  0x1d   :  { %p1427_p0 = por %p1426_p13, %p1425_p12 }
  0x1f   :  { %p1428_p1 = pnand %p1427_p0, %p1421_p11 }
  0x21   :  { %1431 = shalt.err (!%p1428_p1)
}
  0x22   :  { %33 = dma.hbm_to_vmem [thread:$0]  %s2821_s1, 3136, %s28_s24, [#allocation6], %s1449_s19, %s1449_s19, %s1450_s20  }
  0x23   :  { %1442 = dma.done.wait [#allocation3], 3136  }
  0x24   :  { %1443 = vsyncadd [#allocation3], 4294964160 }
  0x25   :  { %1444 = dma.done.wait [#allocation6], 3136  }
  0x26   :  { %1445 = vsyncadd [#allocation6], 4294964160  ;;  %v1492_v0 = vld [vmem:[#allocation2] sm:$0xff]   ;;  %v1494_v1 = vld [vmem:[#allocation2 + $0x8] sm:$0xff]   ;;  %s1432_s8 = scalar_lea.hbm %s2822_s2, 16 }
  0x27   :  { %v1496_v2 = vld [vmem:[#allocation2 + $0x10] sm:$0xff]   ;;  %v1498_v3 = vld [vmem:[#allocation2 + $0x18] sm:$0xff]   ;;  %v1500_v4 = vld [vmem:[#allocation2 + $0x20] sm:$0xff]   ;;  %v2823_v5 = vunpack.c.l.bf16 %v1492_v0  ;;  %v2824_v8 = vunpack.c.h.bf16 %v1492_v0  ;;  %v2825_v9 = vunpack.c.l.bf16 %v1494_v1  ;;  %v2826_v10 = vunpack.c.h.bf16 %v1494_v1  ;;  %p1433_p2 = scmp.ne.s32.totalorder %s2822_s2, %s1432_s8  ;;  %p1436_p3 = scmp.lt.u32.totalorder %s1432_s8, %s2822_s2 }
  0x28   :  { %v1503_v6 = vld [vmem:[#allocation2 + $0x28] sm:$0xff]   ;;  %v1505_v7 = vld [vmem:[#allocation2 + $0x30] sm:$0xff]   ;;  %v2827_v11 = vunpack.c.l.bf16 %v1496_v2  ;;  %v1511_v12 = vld [vmem:[#allocation2 + $0x38] sm:$0xff]   ;;  %v2828_v14 = vunpack.c.h.bf16 %v1496_v2  ;;  %v2830_v15 = vunpack.c.l.bf16 %v1498_v3  ;;  %v2829_v16 = vunpack.c.h.bf16 %v1498_v3 }
  0x29   :  { %v1513_v13 = vld [vmem:[#allocation2 + $0x40] sm:$0xff]   ;;  %v2831_v17 = vunpack.c.l.bf16 %v1500_v4  ;;  %v1519_v18 = vld [vmem:[#allocation2 + $0x48] sm:$0xff]   ;;  %v1521_v19 = vld [vmem:[#allocation2 + $0x50] sm:$0xff]   ;;  %v2832_v20 = vunpack.c.h.bf16 %v1500_v4  ;;  %v2835_v21 = vunpack.c.l.bf16 %v1503_v6  ;;  %v236_v44 = vadd.f32 1e-06, %v2823_v5  ;;  %p1438_p4 = pnand %p1436_p3, %p1433_p2 }
  0x2a   :  { %v1527_v24 = vld [vmem:[#allocation2 + $0x58] sm:$0xff]   ;;  %v1529_v25 = vld [vmem:[#allocation2 + $0x60] sm:$0xff]   ;;  %v1535_v30 = vld [vmem:[#allocation2 + $0x68] sm:$0xff]   ;;  %v237_v40 = vadd.f32 1e-06, %v2824_v8  ;;  %v2926_v34 = vunpack.c.h.bf16 %v1505_v7 }
  0x2b   :  { %v1537_v31 = vld [vmem:[#allocation2 + $0x70] sm:$0xff]   ;;  %v1543_v36 = vld [vmem:[#allocation2 + $0x78] sm:$0xff]   ;;  %v1545_v37 = vld [vmem:[#allocation2 + $0x80] sm:$0xff]   ;;  %v238_v50 = vadd.f32 1e-06, %v2825_v9  ;;  %1192 = vlog2.f32 %v236_v44  ;;  %v2924_v44 = vunpack.c.h.bf16 %v1503_v6 }
  0x2c   :  { %v1551_v42 = vld [vmem:[#allocation2 + $0x88] sm:$0xff]   ;;  %v1553_v43 = vld [vmem:[#allocation2 + $0x90] sm:$0xff]   ;;  %v1559_v48 = vld [vmem:[#allocation2 + $0x98] sm:$0xff]   ;;  %v239_v46 = vadd.f32 1e-06, %v2826_v10  ;;  %1194 = vlog2.f32 %v237_v40  ;;  %v2925_v40 = vunpack.c.l.bf16 %v1505_v7 }
  0x2d   :  { %2900 = vst [vmem:[#allocation11_spill] sm:$0xff] %v1553_v43  ;;  %2901 = vst [vmem:[#allocation12_spill] sm:$0xff] %v1559_v48  ;;  %v1561_v49 = vld [vmem:[#allocation2 + $0xa0] sm:$0xff]   ;;  %v1567_v54 = vld [vmem:[#allocation2 + $0xa8] sm:$0xff]   ;;  %v240_v9 = vadd.f32 1e-06, %v2827_v11  ;;  %1196 = vlog2.f32 %v238_v50 }
  0x2e   :  { %v1569_v55 = vld [vmem:[#allocation2 + $0xb0] sm:$0xff]   ;;  %v1575_v60 = vld [vmem:[#allocation2 + $0xb8] sm:$0xff]   ;;  %v1577_v61 = vld [vmem:[#allocation2 + $0xc0] sm:$0xf]  ;;  %v241_v22 = vadd.f32 1e-06, %v2828_v14  ;;  %1198 = vlog2.f32 %v239_v46 }
  0x2f   :  { %v1583_v51 = vld [vmem:[#allocation5] sm:$0xff]   ;;  %v1585_v56 = vld [vmem:[#allocation5 + $0x8] sm:$0xff]   ;;  %v1591_v47 = vld [vmem:[#allocation5 + $0x10] sm:$0xff]   ;;  %v242_v11 = vadd.f32 1e-06, %v2830_v15  ;;  %1200 = vlog2.f32 %v240_v9  ;;  %v2927_v9 = vunpack.c.l.bf16 %v1511_v12 }
  0x30   :  { %2902 = vst [vmem:[#allocation13_spill] sm:$0xff] %v1583_v51  ;;  %2903 = vst [vmem:[#allocation14_spill] sm:$0xff] %v1585_v56  ;;  %v1593_v62 = vld [vmem:[#allocation5 + $0x18] sm:$0xff]   ;;  %v1599_v45 = vld [vmem:[#allocation5 + $0x20] sm:$0xff]   ;;  %v243_v38 = vadd.f32 1e-06, %v2829_v16  ;;  %1202 = vlog2.f32 %v241_v22  ;;  %v2930_v22 = vunpack.c.h.bf16 %v1513_v13 }
  0x31   :  { %2904 = vst [vmem:[#allocation15_spill] sm:$0xff] %v1591_v47  ;;  %2905 = vst [vmem:[#allocation16_spill] sm:$0xff] %v1593_v62  ;;  %v1601_v58 = vld [vmem:[#allocation5 + $0x28] sm:$0xff]   ;;  %v1607_v41 = vld [vmem:[#allocation5 + $0x30] sm:$0xff]   ;;  %v244_v27 = vadd.f32 1e-06, %v2831_v17  ;;  %1204 = vlog2.f32 %v242_v11  ;;  %v2928_v17 = vunpack.c.h.bf16 %v1511_v12  ;;  %v2933_v11 = vunpack.c.l.bf16 %v1521_v19 }
  0x32   :  { %2906 = vst [vmem:[#allocation17_spill] sm:$0xff] %v1599_v45  ;;  %2907 = vst [vmem:[#allocation18_spill] sm:$0xff] %v1601_v58  ;;  %v1609_v53 = vld [vmem:[#allocation5 + $0x38] sm:$0xff]   ;;  %v1615_v39 = vld [vmem:[#allocation5 + $0x40] sm:$0xff]   ;;  %v245_v50 = vadd.f32 1e-06, %v2832_v20  ;;  %1206 = vlog2.f32 %v243_v38  ;;  %v2948_v58 = vunpack.c.h.bf16 %v1551_v42  ;;  %v2951_v47 = vunpack.c.l.bf16 %v1559_v48 }
  0x33   :  { %2908 = vst [vmem:[#allocation19_spill] sm:$0xff] %v1607_v41  ;;  %2909 = vst [vmem:[#allocation20_spill] sm:$0xff] %v1609_v53  ;;  %v1617_v57 = vld [vmem:[#allocation5 + $0x48] sm:$0xff]   ;;  %v1623_v35 = vld [vmem:[#allocation5 + $0x50] sm:$0xff]   ;;  %v246_v59 = vadd.f32 1e-06, %v2835_v21  ;;  %1208 = vlog2.f32 %v244_v27  ;;  %v2938_v27 = vunpack.c.h.bf16 %v1529_v25 }
  0x34   :  { %2910 = vst [vmem:[#allocation21_spill] sm:$0xff] %v1615_v39  ;;  %2911 = vst [vmem:[#allocation22_spill] sm:$0xff] %v1617_v57  ;;  %v1625_v63 = vld [vmem:[#allocation5 + $0x58] sm:$0xff]   ;;  %v1631_v33 = vld [vmem:[#allocation5 + $0x60] sm:$0xff]   ;;  %v247_v46 = vadd.f32 1e-06, %v2924_v44  ;;  %1210 = vlog2.f32 %v245_v50  ;;  %v2940_v50 = vunpack.c.h.bf16 %v1535_v30  ;;  %v2945_v39 = vunpack.c.l.bf16 %v1545_v37 }
  0x35   :  { %2912 = vst [vmem:[#allocation23_spill] sm:$0xff] %v1623_v35  ;;  %2913 = vst [vmem:[#allocation24_spill] sm:$0xff] %v1625_v63  ;;  %v1637_v32 = vld [vmem:[#allocation5 + $0x68] sm:$0xff]   ;;  %v1639_v29 = vld [vmem:[#allocation5 + $0x70] sm:$0xff]   ;;  %v248_v16 = vadd.f32 1e-06, %v2925_v40  ;;  %v1193_v38 = vpop.eup %1192  ;;  %1212 = vlog2.f32 %v246_v59  ;;  %v2942_v63 = vunpack.c.h.bf16 %v1537_v31  ;;  %v2943_v59 = vunpack.c.l.bf16 %v1543_v36 }
  0x36   :  { %2914 = vst [vmem:[#allocation25_spill] sm:$0xff] %v1631_v33  ;;  %2915 = vst [vmem:[#allocation26_spill] sm:$0xff] %v1637_v32  ;;  %v1644_v52 = vld [vmem:[#allocation5 + $0x78] sm:$0xff]   ;;  %v1651_v28 = vld [vmem:[#allocation5 + $0x80] sm:$0xff]   ;;  %v249_v15 = vadd.f32 1e-06, %v2926_v34  ;;  %1214 = vlog2.f32 %v247_v46  ;;  %v2946_v46 = vunpack.c.h.bf16 %v1545_v37 }
  0x37   :  { %2916 = vst [vmem:[#allocation27_spill] sm:$0xff] %v1639_v29  ;;  %2917 = vst [vmem:[#allocation28_spill] sm:$0xff] %v1644_v52  ;;  %v1658_v26 = vld [vmem:[#allocation5 + $0x88] sm:$0xff]   ;;  %v1665_v23 = vld [vmem:[#allocation5 + $0x90] sm:$0xff]   ;;  %v250_v14 = vadd.f32 1e-06, %v2927_v9  ;;  %v2939_v29 = vunpack.c.l.bf16 %v1535_v30  ;;  %1216 = vlog2.f32 %v248_v16  ;;  %v2949_v16 = vunpack.c.l.bf16 %v1553_v43 }
  0x38   :  { %2918 = vst [vmem:[#allocation29_spill] sm:$0xff] %v1651_v28  ;;  %2919 = vst [vmem:[#allocation30_spill] sm:$0xff] %v1658_v26  ;;  %v1671_v8 = vld [vmem:[#allocation5 + $0x98] sm:$0xff]   ;;  %v1677_v5 = vld [vmem:[#allocation5 + $0xa0] sm:$0xff]   ;;  %v251_v20 = vadd.f32 1e-06, %v2928_v17  ;;  %v2934_v26 = vunpack.c.h.bf16 %v1521_v19  ;;  %v2935_v28 = vunpack.c.l.bf16 %v1527_v24  ;;  %1218 = vlog2.f32 %v249_v15 }
  0x39   :  { %2920 = vst [vmem:[#allocation31_spill] sm:$0xff] %v1665_v23  ;;  %2921 = vst [vmem:[#allocation32_spill] sm:$0xff] %v1671_v8  ;;  %v1683_v10 = vld [vmem:[#allocation5 + $0xa8] sm:$0xff]   ;;  %v253_v44 = vadd.f32 1e-06, %v2930_v22  ;;  %v2931_v8 = vunpack.c.l.bf16 %v1519_v18  ;;  %v2932_v23 = vunpack.c.h.bf16 %v1519_v18  ;;  %v2936_v22 = vunpack.c.h.bf16 %v1527_v24 }
  0x3a   :  { %2922 = vst [vmem:[#allocation33_spill] sm:$0xff] %v1677_v5  ;;  %2923 = vst [vmem:[#allocation34_spill] sm:$0xff] %v1683_v10  ;;  %v2929_v5 = vunpack.c.l.bf16 %v1513_v13  ;;  %v256_v9 = vadd.f32 1e-06, %v2933_v11  ;;  %v257_v17 = vadd.f32 1e-06, %v2934_v26  ;;  %v1195_v26 = vpop.eup %1194  ;;  %1220 = vlog2.f32 %v250_v14 }
  0x3b   :  { %v254_v40 = vadd.f32 1e-06, %v2931_v8  ;;  %v255_v34 = vadd.f32 1e-06, %v2932_v23  ;;  %v1728_v52 = vadd.f32 1e-06, %v2936_v22  ;;  %v2937_v8 = vunpack.c.l.bf16 %v1529_v25 }
  0x3c   :  { %v252_v21 = vadd.f32 1e-06, %v2929_v5  ;;  %v1724_v5 = vadd.f32 1e-06, %v2935_v28  ;;  %v1736_v11 = vadd.f32 1e-06, %v2938_v27  ;;  %v2941_v22 = vunpack.c.l.bf16 %v1537_v31 }
  0x3d   :  { %v1732_v23 = vadd.f32 1e-06, %v2937_v8  ;;  %v1740_v28 = vadd.f32 1e-06, %v2939_v29  ;;  %v1744_v32 = vadd.f32 1e-06, %v2940_v50  ;;  %v1197_v8 = vpop.eup %1196  ;;  %v2944_v29 = vunpack.c.h.bf16 %v1543_v36 }
  0x3e   :  { %v1748_v33 = vadd.f32 1e-06, %v2941_v22  ;;  %v1752_v27 = vadd.f32 1e-06, %v2942_v63  ;;  %v1756_v35 = vadd.f32 1e-06, %v2943_v59  ;;  %v1199_v50 = vpop.eup %1198  ;;  %v2947_v63 = vunpack.c.l.bf16 %v1551_v42 }
  0x3f   :  { %v1760_v57 = vadd.f32 1e-06, %v2944_v29  ;;  %v1764_v22 = vadd.f32 1e-06, %v2945_v39  ;;  %v1768_v53 = vadd.f32 1e-06, %v2946_v46  ;;  %v1201_v59 = vpop.eup %1200  ;;  %v2950_v39 = vunpack.c.h.bf16 %v1553_v43 }
  0x40   :  { %v1772_v41 = vadd.f32 1e-06, %v2947_v63  ;;  %v1776_v29 = vadd.f32 1e-06, %v2948_v58  ;;  %v1780_v45 = vadd.f32 1e-06, %v2949_v16  ;;  %v1203_v46 = vpop.eup %1202  ;;  %v2953_v15 = vunpack.c.h.bf16 %v1559_v48 }
  0x41   :  { %v1784_v62 = vadd.f32 1e-06, %v2950_v39  ;;  %v1788_v63 = vadd.f32 1e-06, %v2951_v47  ;;  %v2954_v58 = vunpack.c.l.bf16 %v1561_v49  ;;  %1222 = vlog2.f32 %v251_v20  ;;  %v1205_v16 = vpop.eup %1204 }
  0x42   :  { %v1792_v56 = vadd.f32 1e-06, %v2953_v15  ;;  %v2956_v10 = vunpack.c.h.bf16 %v1561_v49  ;;  %v2958_v14 = vunpack.c.l.bf16 %v1567_v54  ;;  %v2960_v47 = vunpack.c.h.bf16 %v1567_v54  ;;  %v1207_v15 = vpop.eup %1206 }
  0x43   :  { %2952 = vst [vmem:[#allocation35_spill] sm:$0xff] %v1788_v63  ;;  %v1796_v51 = vadd.f32 1e-06, %v2954_v58  ;;  %1224 = vlog2.f32 %v252_v21  ;;  %v2962_v48 = vunpack.c.l.bf16 %v1569_v55  ;;  %v2964_v20 = vunpack.c.h.bf16 %v1569_v55 }
  0x44   :  { %v1800_v39 = vadd.f32 1e-06, %v2956_v10  ;;  %v1804_v43 = vadd.f32 1e-06, %v2958_v14  ;;  %v1808_v63 = vadd.f32 1e-06, %v2960_v47  ;;  %v2966_v10 = vunpack.c.l.bf16 %v1575_v60  ;;  %v1209_v14 = vpop.eup %1208 }
  0x45   :  { %2955 = vst [vmem:[#allocation36_spill] sm:$0xff] %v1796_v51  ;;  %v1812_v58 = vadd.f32 1e-06, %v2962_v48  ;;  %v1816_v51 = vadd.f32 1e-06, %v2964_v20  ;;  %1226 = vlog2.f32 %v253_v44  ;;  %v2969_v21 = vunpack.c.l.bf16 %v1577_v61 }
  0x46   :  { %2957 = vst [vmem:[#allocation37_spill] sm:$0xff] %v1800_v39  ;;  %2959 = vst [vmem:[#allocation38_spill] sm:$0xff] %v1804_v43  ;;  %v1820_v39 = vadd.f32 1e-06, %v2966_v10  ;;  %v2968_v43 = vunpack.c.h.bf16 %v1575_v60  ;;  %v1830_v48 = vmul.f32 0.6931472, %v1193_v38  ;;  %1228 = vlog2.f32 %v254_v40 }
  0x47   :  { %2961 = vst [vmem:[#allocation39_spill] sm:$0xff] %v1808_v63  ;;  %2963 = vst [vmem:[#allocation40_spill] sm:$0xff] %v1812_v58  ;;  %v1828_v63 = vadd.f32 1e-06, %v2969_v21  ;;  %v1211_v58 = vpop.eup %1210  ;;  %v1832_v20 = vmul.f32 0.6931472, %v1195_v26  ;;  %1230 = vlog2.f32 %v255_v34  ;;  %v2977_v21 = vunpack.c.l.bf16 %v1492_v0 }
  0x48   :  { %2965 = vst [vmem:[#allocation41_spill] sm:$0xff] %v1816_v51  ;;  %2967 = vst [vmem:[#allocation42_spill] sm:$0xff] %v1820_v39  ;;  %v1824_v47 = vadd.f32 1e-06, %v2968_v43  ;;  %v1834_v51 = vmul.f32 0.6931472, %v1197_v8  ;;  %v1213_v44 = vpop.eup %1212  ;;  %1232 = vlog2.f32 %v256_v9  ;;  %v2979_v26 = vunpack.c.h.bf16 %v1492_v0 }
  0x49   :  { %2970 = vst [vmem:[#allocation43_spill] sm:$0xff] %v1828_v63  ;;  %2971 = vst [vmem:[#allocation44_spill] sm:$0xff] %v1830_v48  ;;  %v1836_v10 = vmul.f32 0.6931472, %v1199_v50  ;;  %v1838_v39 = vmul.f32 0.6931472, %v1201_v59  ;;  %v1215_v38 = vpop.eup %1214  ;;  %1234 = vlog2.f32 %v257_v17  ;;  %v2980_v34 = vunpack.c.l.bf16 %v1494_v1 }
  0x4a   :  { %2972 = vst [vmem:[#allocation45_spill] sm:$0xff] %v1832_v20  ;;  %2973 = vst [vmem:[#allocation46_spill] sm:$0xff] %v1834_v51  ;;  %v1840_v43 = vmul.f32 0.6931472, %v1203_v46  ;;  %v1844_v63 = vsub.f32 1.0, %v2977_v21  ;;  %v1850_v8 = vsub.f32 1.0, %v2979_v26  ;;  %v1217_v59 = vpop.eup %1216  ;;  %1236 = vlog2.f32 %v1724_v5 }
  0x4b   :  { %2974 = vst [vmem:[#allocation47_spill] sm:$0xff] %v1836_v10  ;;  %2975 = vst [vmem:[#allocation48_spill] sm:$0xff] %v1838_v39  ;;  %v1846_v40 = vmul.f32 0.6931472, %v1205_v16  ;;  %v1854_v50 = vsub.f32 1.0, %v2980_v34  ;;  %v2982_v9 = vunpack.c.h.bf16 %v1494_v1  ;;  %v2983_v16 = vunpack.c.l.bf16 %v1496_v2  ;;  %v1219_v0 = vpop.eup %1218 }
  0x4c   :  { %2976 = vst [vmem:[#allocation49_spill] sm:$0xff] %v1840_v43  ;;  %v1856_v46 = vmul.f32 0.6931472, %v1207_v15  ;;  %v1867_v26 = vmul.f32 0.6931472, %v1209_v14  ;;  %1238 = vlog2.f32 %v1728_v52  ;;  %v2985_v34 = vunpack.c.h.bf16 %v1496_v2  ;;  %v1221_v1 = vpop.eup %1220  ;;  %v3039_v10 = vld [vmem:[#allocation36_spill] sm:$0xff] }
  0x4d   :  { %2978 = vst [vmem:[#allocation50_spill] sm:$0xff] %v1846_v40  ;;  %v1861_v21 = vsub.f32 1.0, %v2982_v9  ;;  %v1865_v17 = vsub.f32 1.0, %v2983_v16  ;;  %v2986_v15 = vunpack.c.l.bf16 %v1498_v3  ;;  %v1878_v9 = vmul.f32 0.6931472, %v1211_v58  ;;  %v1223_v2 = vpop.eup %1222 }
  0x4e   :  { %2981 = vst [vmem:[#allocation51_spill] sm:$0xff] %v1856_v46  ;;  %2984 = vst [vmem:[#allocation52_spill] sm:$0xff] %v1867_v26  ;;  %v1872_v40 = vsub.f32 1.0, %v2985_v34  ;;  %1240 = vlog2.f32 %v1732_v23  ;;  %v2988_v16 = vunpack.c.h.bf16 %v1498_v3  ;;  %v2989_v14 = vunpack.c.l.bf16 %v1500_v4  ;;  %v1225_v3 = vpop.eup %1224 }
  0x4f   :  { %v1876_v5 = vsub.f32 1.0, %v2986_v15  ;;  %2987 = vst [vmem:[#allocation53_spill] sm:$0xff] %v1878_v9  ;;  %v1889_v34 = vmul.f32 0.6931472, %v1213_v44  ;;  %1242 = vlog2.f32 %v1736_v11  ;;  %v2991_v15 = vunpack.c.h.bf16 %v1500_v4  ;;  %v1227_v4 = vpop.eup %1226 }
  0x50   :  { %v1883_v46 = vsub.f32 1.0, %v2988_v16  ;;  %v1887_v52 = vsub.f32 1.0, %v2989_v14  ;;  %v2992_v58 = vunpack.c.l.bf16 %v1503_v6  ;;  %v1900_v16 = vmul.f32 0.6931472, %v1215_v38 }
  0x51   :  { %2990 = vst [vmem:[#allocation54_spill] sm:$0xff] %v1889_v34  ;;  %v1894_v26 = vsub.f32 1.0, %v2991_v15  ;;  %1244 = vlog2.f32 %v1740_v28  ;;  %v2994_v14 = vunpack.c.h.bf16 %v1503_v6  ;;  %v2995_v44 = vunpack.c.l.bf16 %v1505_v7  ;;  %v1229_v6 = vpop.eup %1228 }
  0x52   :  { %v1898_v23 = vsub.f32 1.0, %v2992_v58  ;;  %2993 = vst [vmem:[#allocation55_spill] sm:$0xff] %v1900_v16  ;;  %v1911_v15 = vmul.f32 0.6931472, %v1217_v59  ;;  %1246 = vlog2.f32 %v1744_v32  ;;  %v2997_v58 = vunpack.c.h.bf16 %v1505_v7  ;;  %v1231_v7 = vpop.eup %1230 }
  0x53   :  { %v1905_v9 = vsub.f32 1.0, %v2994_v14  ;;  %v1909_v11 = vsub.f32 1.0, %v2995_v44  ;;  %v2998_v38 = vunpack.c.l.bf16 %v1511_v12  ;;  %v1922_v14 = vmul.f32 0.6931472, %v1219_v0 }
  0x54   :  { %2996 = vst [vmem:[#allocation56_spill] sm:$0xff] %v1911_v15  ;;  %v1916_v34 = vsub.f32 1.0, %v2997_v58  ;;  %1248 = vlog2.f32 %v1748_v33  ;;  %v3000_v44 = vunpack.c.h.bf16 %v1511_v12  ;;  %v3001_v59 = vunpack.c.l.bf16 %v1513_v13  ;;  %v1233_v12 = vpop.eup %1232 }
  0x55   :  { %v1920_v28 = vsub.f32 1.0, %v2998_v38  ;;  %2999 = vst [vmem:[#allocation57_spill] sm:$0xff] %v1922_v14  ;;  %v1933_v58 = vmul.f32 0.6931472, %v1221_v1  ;;  %1250 = vlog2.f32 %v1752_v27  ;;  %v3003_v38 = vunpack.c.h.bf16 %v1513_v13  ;;  %v1235_v13 = vpop.eup %1234 }
  0x56   :  { %v1927_v16 = vsub.f32 1.0, %v3000_v44  ;;  %v1931_v32 = vsub.f32 1.0, %v3001_v59  ;;  %v3004_v0 = vunpack.c.l.bf16 %v1519_v18  ;;  %v1944_v44 = vmul.f32 0.6931472, %v1223_v2 }
  0x57   :  { %3002 = vst [vmem:[#allocation58_spill] sm:$0xff] %v1933_v58  ;;  %v1938_v15 = vsub.f32 1.0, %v3003_v38  ;;  %1252 = vlog2.f32 %v1756_v35  ;;  %v3006_v59 = vunpack.c.h.bf16 %v1519_v18  ;;  %v3007_v1 = vunpack.c.l.bf16 %v1521_v19  ;;  %v1237_v18 = vpop.eup %1236 }
  0x58   :  { %v1942_v33 = vsub.f32 1.0, %v3004_v0  ;;  %3005 = vst [vmem:[#allocation59_spill] sm:$0xff] %v1944_v44  ;;  %v1955_v38 = vmul.f32 0.6931472, %v1225_v3  ;;  %1254 = vlog2.f32 %v1760_v57  ;;  %v3009_v0 = vunpack.c.h.bf16 %v1521_v19  ;;  %v1239_v19 = vpop.eup %1238 }
  0x59   :  { %v1949_v14 = vsub.f32 1.0, %v3006_v59  ;;  %v1953_v27 = vsub.f32 1.0, %v3007_v1  ;;  %v3010_v2 = vunpack.c.l.bf16 %v1527_v24  ;;  %v1966_v59 = vmul.f32 0.6931472, %v1227_v4 }
  0x5a   :  { %3008 = vst [vmem:[#allocation60_spill] sm:$0xff] %v1955_v38  ;;  %v1960_v58 = vsub.f32 1.0, %v3009_v0  ;;  %1256 = vlog2.f32 %v1764_v22  ;;  %v3012_v1 = vunpack.c.h.bf16 %v1527_v24  ;;  %v3013_v3 = vunpack.c.l.bf16 %v1529_v25  ;;  %v1241_v24 = vpop.eup %1240 }
  0x5b   :  { %v1964_v35 = vsub.f32 1.0, %v3010_v2  ;;  %3011 = vst [vmem:[#allocation61_spill] sm:$0xff] %v1966_v59  ;;  %v1977_v0 = vmul.f32 0.6931472, %v1229_v6  ;;  %1258 = vlog2.f32 %v1768_v53  ;;  %v3015_v2 = vunpack.c.h.bf16 %v1529_v25  ;;  %v1243_v25 = vpop.eup %1242 }
  0x5c   :  { %v1971_v44 = vsub.f32 1.0, %v3012_v1  ;;  %v1975_v57 = vsub.f32 1.0, %v3013_v3  ;;  %v3016_v4 = vunpack.c.l.bf16 %v1535_v30  ;;  %v1988_v1 = vmul.f32 0.6931472, %v1231_v7 }
  0x5d   :  { %3014 = vst [vmem:[#allocation62_spill] sm:$0xff] %v1977_v0  ;;  %v1982_v38 = vsub.f32 1.0, %v3015_v2  ;;  %1260 = vlog2.f32 %v1772_v41  ;;  %v3018_v3 = vunpack.c.h.bf16 %v1535_v30  ;;  %v3019_v6 = vunpack.c.l.bf16 %v1537_v31  ;;  %v1245_v30 = vpop.eup %1244 }
  0x5e   :  { %v1986_v22 = vsub.f32 1.0, %v3016_v4  ;;  %3017 = vst [vmem:[#allocation63_spill] sm:$0xff] %v1988_v1  ;;  %v1999_v2 = vmul.f32 0.6931472, %v1233_v12  ;;  %1262 = vlog2.f32 %v1776_v29  ;;  %v3021_v4 = vunpack.c.h.bf16 %v1537_v31  ;;  %v1247_v31 = vpop.eup %1246 }
  0x5f   :  { %v1993_v59 = vsub.f32 1.0, %v3018_v3  ;;  %v1997_v53 = vsub.f32 1.0, %v3019_v6  ;;  %v3022_v7 = vunpack.c.l.bf16 %v1543_v36  ;;  %v2010_v3 = vmul.f32 0.6931472, %v1235_v13 }
  0x60   :  { %3020 = vst [vmem:[#allocation64_spill] sm:$0xff] %v1999_v2  ;;  %v2004_v0 = vsub.f32 1.0, %v3021_v4  ;;  %1264 = vlog2.f32 %v1780_v45  ;;  %v3024_v6 = vunpack.c.h.bf16 %v1543_v36  ;;  %v3025_v12 = vunpack.c.l.bf16 %v1545_v37  ;;  %v1249_v36 = vpop.eup %1248 }
  0x61   :  { %v2008_v41 = vsub.f32 1.0, %v3022_v7  ;;  %3023 = vst [vmem:[#allocation65_spill] sm:$0xff] %v2010_v3  ;;  %v2021_v4 = vmul.f32 0.6931472, %v1237_v18  ;;  %1266 = vlog2.f32 %v1784_v62  ;;  %v3027_v7 = vunpack.c.h.bf16 %v1545_v37  ;;  %v3030_v3 = vld [vmem:[#allocation35_spill] sm:$0xff]  ;;  %v1251_v37 = vpop.eup %1250 }
  0x62   :  { %v2015_v1 = vsub.f32 1.0, %v3024_v6  ;;  %v2019_v29 = vsub.f32 1.0, %v3025_v12  ;;  %v3028_v13 = vunpack.c.l.bf16 %v1551_v42  ;;  %v2032_v6 = vmul.f32 0.6931472, %v1239_v19  ;;  %v3032_v18 = vld [vmem:[#allocation11_spill] sm:$0xff]  ;;  %v3036_v19 = vld [vmem:[#allocation12_spill] sm:$0xff] }
  0x63   :  { %3026 = vst [vmem:[#allocation66_spill] sm:$0xff] %v2021_v4  ;;  %v2026_v2 = vsub.f32 1.0, %v3027_v7  ;;  %1268 = vlog2.f32 %v3030_v3  ;;  %v3031_v12 = vunpack.c.h.bf16 %v1551_v42  ;;  %v3033_v4 = vunpack.c.l.bf16 %v3032_v18  ;;  %v1253_v42 = vpop.eup %1252 }
  0x64   :  { %v2030_v45 = vsub.f32 1.0, %v3028_v13  ;;  %3029 = vst [vmem:[#allocation67_spill] sm:$0xff] %v2032_v6  ;;  %v2043_v7 = vmul.f32 0.6931472, %v1241_v24  ;;  %1270 = vlog2.f32 %v1792_v56  ;;  %v3035_v13 = vunpack.c.h.bf16 %v3032_v18  ;;  %v1255_v18 = vpop.eup %1254 }
  0x65   :  { %v2037_v43 = vsub.f32 1.0, %v3031_v12  ;;  %v2041_v62 = vsub.f32 1.0, %v3033_v4  ;;  %v3037_v6 = vunpack.c.l.bf16 %v3036_v19  ;;  %v2054_v12 = vmul.f32 0.6931472, %v1243_v25 }
  0x66   :  { %3034 = vst [vmem:[#allocation35_spill] sm:$0xff] %v2043_v7  ;;  %v2048_v39 = vsub.f32 1.0, %v3035_v13  ;;  %1272 = vlog2.f32 %v3039_v10  ;;  %v3040_v4 = vunpack.c.h.bf16 %v3036_v19  ;;  %v3041_v24 = vunpack.c.l.bf16 %v1561_v49  ;;  %v3043_v7 = vld [vmem:[#allocation37_spill] sm:$0xff]  ;;  %v1257_v19 = vpop.eup %1256 }
  0x67   :  { %v2052_v3 = vsub.f32 1.0, %v3037_v6  ;;  %3038 = vst [vmem:[#allocation11_spill] sm:$0xff] %v2054_v12  ;;  %v2065_v13 = vmul.f32 0.6931472, %v1245_v30  ;;  %1274 = vlog2.f32 %v3043_v7  ;;  %v3044_v6 = vunpack.c.h.bf16 %v1561_v49  ;;  %v3048_v12 = vld [vmem:[#allocation38_spill] sm:$0xff]  ;;  %v1259_v49 = vpop.eup %1258 }
  0x68   :  { %v2059_v51 = vsub.f32 1.0, %v3040_v4  ;;  %v2063_v56 = vsub.f32 1.0, %v3041_v24  ;;  %v3045_v25 = vunpack.c.l.bf16 %v1567_v54  ;;  %v2076_v4 = vmul.f32 0.6931472, %v1247_v31 }
  0x69   :  { %3042 = vst [vmem:[#allocation12_spill] sm:$0xff] %v2065_v13  ;;  %v2070_v20 = vsub.f32 1.0, %v3044_v6  ;;  %1276 = vlog2.f32 %v3048_v12  ;;  %v3049_v24 = vunpack.c.h.bf16 %v1567_v54  ;;  %v3050_v30 = vunpack.c.l.bf16 %v1569_v55  ;;  %v3053_v13 = vld [vmem:[#allocation39_spill] sm:$0xff]  ;;  %v1261_v54 = vpop.eup %1260 }
  0x6a   :  { %v2074_v10 = vsub.f32 1.0, %v3045_v25  ;;  %3047 = vst [vmem:[#allocation37_spill] sm:$0xff] %v2076_v4  ;;  %v2087_v6 = vmul.f32 0.6931472, %v1249_v36  ;;  %1278 = vlog2.f32 %v3053_v13  ;;  %v3054_v25 = vunpack.c.h.bf16 %v1569_v55  ;;  %v3058_v4 = vld [vmem:[#allocation40_spill] sm:$0xff]  ;;  %v1263_v55 = vpop.eup %1262 }
  0x6b   :  { %v2081_v48 = vsub.f32 1.0, %v3049_v24  ;;  %v2085_v7 = vsub.f32 1.0, %v3050_v30  ;;  %v3055_v31 = vunpack.c.l.bf16 %v1575_v60  ;;  %v2098_v24 = vmul.f32 0.6931472, %v1251_v37 }
  0x6c   :  { %3046 = vst [vmem:[#allocation36_spill] sm:$0xff] %v2074_v10  ;;  %3052 = vst [vmem:[#allocation68_spill] sm:$0xff] %v2087_v6  ;;  %v2092_v10 = vsub.f32 1.0, %v3054_v25  ;;  %1280 = vlog2.f32 %v3058_v4  ;;  %v3059_v30 = vunpack.c.h.bf16 %v1575_v60  ;;  %v3060_v36 = vunpack.c.l.bf16 %v1577_v61  ;;  %v3062_v6 = vld [vmem:[#allocation41_spill] sm:$0xff]  ;;  %v3064_v4 = vld [vmem:[#allocation42_spill] sm:$0xff] }
  0x6d   :  { %3051 = vst [vmem:[#allocation38_spill] sm:$0xff] %v2085_v7  ;;  %v2096_v12 = vsub.f32 1.0, %v3055_v31  ;;  %3057 = vst [vmem:[#allocation69_spill] sm:$0xff] %v2098_v24  ;;  %v2109_v25 = vmul.f32 0.6931472, %v1253_v42  ;;  %1282 = vlog2.f32 %v3062_v6  ;;  %v1265_v24 = vpop.eup %1264 }
  0x6e   :  { %v2103_v7 = vsub.f32 1.0, %v3059_v30  ;;  %v2107_v13 = vsub.f32 1.0, %v3060_v36  ;;  %v432_v31 = vadd.f32 1e-06, %v1844_v63  ;;  %v433_v37 = vadd.f32 1e-06, %v1850_v8  ;;  %v1267_v30 = vpop.eup %1266 }
  0x6f   :  { %3056 = vst [vmem:[#allocation39_spill] sm:$0xff] %v2096_v12  ;;  %3061 = vst [vmem:[#allocation40_spill] sm:$0xff] %v2109_v25  ;;  %v2114_v12 = vmul.f32 0.6931472, %v1255_v18  ;;  %1284 = vlog2.f32 %v3064_v4  ;;  %v434_v60 = vadd.f32 1e-06, %v1854_v50  ;;  %v1269_v6 = vpop.eup %1268 }
  0x70   :  { %v435_v61 = vadd.f32 1e-06, %v1861_v21  ;;  %v2119_v36 = vmul.f32 0.6931472, %v1257_v19  ;;  %1286 = vlog2.f32 %v1824_v47  ;;  %v436_v42 = vadd.f32 1e-06, %v1865_v17 }
  0x71   :  { %3063 = vst [vmem:[#allocation41_spill] sm:$0xff] %v2114_v12  ;;  %v437_v63 = vadd.f32 1e-06, %v1872_v40  ;;  %v2124_v8 = vmul.f32 0.6931472, %v1259_v49  ;;  %v3067_v18 = vld [vmem:[#allocation43_spill] sm:$0xff]  ;;  %v1271_v12 = vpop.eup %1270 }
  0x72   :  { %3065 = vst [vmem:[#allocation42_spill] sm:$0xff] %v2119_v36  ;;  %1288 = vlog2.f32 %v3067_v18  ;;  %v438_v4 = vadd.f32 1e-06, %v1876_v5  ;;  %v439_v50 = vadd.f32 1e-06, %v1883_v46  ;;  %v1273_v17 = vpop.eup %1272  ;;  %v3128_v25 = vld [vmem:[#allocation16_spill] sm:$0xff] }
  0x73   :  { %3066 = vst [vmem:[#allocation70_spill] sm:$0xff] %v2124_v8  ;;  %v2129_v21 = vmul.f32 0.6931472, %v1261_v54  ;;  %v440_v19 = vadd.f32 1e-06, %v1887_v52  ;;  %1290 = vlog2.f32 %v432_v31  ;;  %v1275_v18 = vpop.eup %1274 }
  0x74   :  { %v441_v47 = vadd.f32 1e-06, %v1894_v26  ;;  %v2133_v36 = vmul.f32 0.6931472, %v1263_v55  ;;  %v442_v40 = vadd.f32 1e-06, %v1898_v23  ;;  %1292 = vlog2.f32 %v433_v37  ;;  %v1277_v52 = vpop.eup %1276 }
  0x75   :  { %3068 = vst [vmem:[#allocation43_spill] sm:$0xff] %v2129_v21  ;;  %v443_v49 = vadd.f32 1e-06, %v1905_v9  ;;  %v2137_v5 = vmul.f32 0.6931472, %v1265_v24  ;;  %1294 = vlog2.f32 %v434_v60  ;;  %v1279_v9 = vpop.eup %1278 }
  0x76   :  { %3069 = vst [vmem:[#allocation71_spill] sm:$0xff] %v2133_v36  ;;  %v444_v46 = vadd.f32 1e-06, %v1909_v11  ;;  %v445_v54 = vadd.f32 1e-06, %v1916_v34  ;;  %1296 = vlog2.f32 %v435_v61  ;;  %v1281_v34 = vpop.eup %1280 }
  0x77   :  { %3070 = vst [vmem:[#allocation72_spill] sm:$0xff] %v2137_v5  ;;  %v2141_v21 = vmul.f32 0.6931472, %v1267_v30  ;;  %v2144_v26 = vadd.f32 1e-06, %v1920_v28  ;;  %1298 = vlog2.f32 %v436_v42  ;;  %v1283_v37 = vpop.eup %1282 }
  0x78   :  { %v2147_v55 = vadd.f32 1e-06, %v1927_v16  ;;  %v2149_v23 = vmul.f32 0.6931472, %v1269_v6  ;;  %v2152_v24 = vadd.f32 1e-06, %v1931_v32  ;;  %1300 = vlog2.f32 %v437_v63 }
  0x79   :  { %3071 = vst [vmem:[#allocation73_spill] sm:$0xff] %v2141_v21  ;;  %v2155_v11 = vadd.f32 1e-06, %v1938_v15  ;;  %v2157_v31 = vmul.f32 0.6931472, %v1271_v12  ;;  %1302 = vlog2.f32 %v438_v4  ;;  %v1285_v61 = vpop.eup %1284 }
  0x7a   :  { %3072 = vst [vmem:[#allocation74_spill] sm:$0xff] %v2149_v23  ;;  %v2160_v28 = vadd.f32 1e-06, %v1942_v33  ;;  %v2163_v16 = vadd.f32 1e-06, %v1949_v14  ;;  %1304 = vlog2.f32 %v439_v50  ;;  %v1287_v30 = vpop.eup %1286  ;;  %v2197_v50 = vld [vmem:[#allocation5 + $0xb0] sm:$0xff]  }
  0x7b   :  { %3073 = vst [vmem:[#allocation75_spill] sm:$0xff] %v2157_v31  ;;  %v2165_v60 = vmul.f32 0.6931472, %v1273_v17  ;;  %v2168_v32 = vadd.f32 1e-06, %v1953_v27  ;;  %1306 = vlog2.f32 %v440_v19  ;;  %3078 = vst [vmem:[#allocation80_spill] sm:$0xff] %v2197_v50 }
  0x7c   :  { %v2171_v15 = vadd.f32 1e-06, %v1960_v58  ;;  %v2173_v12 = vmul.f32 0.6931472, %v1275_v18  ;;  %v2176_v33 = vadd.f32 1e-06, %v1964_v35  ;;  %v1289_v63 = vpop.eup %1288  ;;  %1308 = vlog2.f32 %v441_v47 }
  0x7d   :  { %3074 = vst [vmem:[#allocation76_spill] sm:$0xff] %v2165_v60  ;;  %v2179_v14 = vadd.f32 1e-06, %v1971_v44  ;;  %v2181_v42 = vmul.f32 0.6931472, %v1277_v52  ;;  %v1291_v4 = vpop.eup %1290  ;;  %1310 = vlog2.f32 %v442_v40 }
  0x7e   :  { %3075 = vst [vmem:[#allocation77_spill] sm:$0xff] %v2173_v12  ;;  %v2184_v27 = vadd.f32 1e-06, %v1975_v57  ;;  %v2187_v58 = vadd.f32 1e-06, %v1982_v38  ;;  %v1293_v19 = vpop.eup %1292  ;;  %1312 = vlog2.f32 %v443_v49  ;;  %v3108_v12 = vld [vmem:[#allocation50_spill] sm:$0xff] }
  0x7f   :  { %3076 = vst [vmem:[#allocation78_spill] sm:$0xff] %v2181_v42  ;;  %v2189_v6 = vmul.f32 0.6931472, %v1279_v9  ;;  %v2192_v35 = vadd.f32 1e-06, %v1986_v22  ;;  %v1295_v9 = vpop.eup %1294  ;;  %1314 = vlog2.f32 %v444_v46 }
  0x80   :  { %v2195_v44 = vadd.f32 1e-06, %v1993_v59  ;;  %v2199_v17 = vmul.f32 0.6931472, %v1281_v34  ;;  %v2202_v57 = vadd.f32 1e-06, %v1997_v53  ;;  %v1297_v40 = vpop.eup %1296  ;;  %1316 = vlog2.f32 %v445_v54 }
  0x81   :  { %3077 = vst [vmem:[#allocation79_spill] sm:$0xff] %v2189_v6  ;;  %v2205_v38 = vadd.f32 1e-06, %v2004_v0  ;;  %v2208_v52 = vmul.f32 0.6931472, %v1283_v37  ;;  %1318 = vlog2.f32 %v2144_v26 }
  0x82   :  { %3079 = vst [vmem:[#allocation81_spill] sm:$0xff] %v2199_v17  ;;  %v2211_v59 = vadd.f32 1e-06, %v2008_v41  ;;  %v2214_v47 = vadd.f32 1e-06, %v2015_v1  ;;  %v1299_v1 = vpop.eup %1298  ;;  %1320 = vlog2.f32 %v2147_v55 }
  0x83   :  { %3081 = vst [vmem:[#allocation82_spill] sm:$0xff] %v2208_v52  ;;  %v2216_v34 = vmul.f32 0.6931472, %v1285_v61  ;;  %v2219_v53 = vadd.f32 1e-06, %v2019_v29  ;;  %v2232_v61 = vld [vmem:[#allocation5 + $0xb8] sm:$0xff]   ;;  %v1301_v49 = vpop.eup %1300  ;;  %1322 = vlog2.f32 %v2152_v24 }
  0x84   :  { %v2222_v0 = vadd.f32 1e-06, %v2026_v2  ;;  %v2224_v22 = vmul.f32 0.6931472, %v1287_v30  ;;  %v2227_v37 = vadd.f32 1e-06, %v2030_v45  ;;  %1324 = vlog2.f32 %v2155_v11 }
  0x85   :  { %3082 = vst [vmem:[#allocation83_spill] sm:$0xff] %v2216_v34  ;;  %v2230_v41 = vadd.f32 1e-06, %v2037_v43  ;;  %3084 = vst [vmem:[#allocation85_spill] sm:$0xff] %v2232_v61  ;;  %v2234_v34 = vmul.f32 0.6931472, %v1289_v63  ;;  %v1303_v63 = vpop.eup %1302  ;;  %1326 = vlog2.f32 %v2160_v28 }
  0x86   :  { %3083 = vst [vmem:[#allocation84_spill] sm:$0xff] %v2224_v22  ;;  %v2237_v29 = vadd.f32 1e-06, %v2041_v62  ;;  %v2240_v2 = vadd.f32 1e-06, %v2048_v39  ;;  %v3095_v45 = vld [vmem:[#allocation38_spill] sm:$0xff]  ;;  %1328 = vlog2.f32 %v2163_v16 }
  0x87   :  { %3085 = vst [vmem:[#allocation86_spill] sm:$0xff] %v2234_v34  ;;  %v2244_v30 = vadd.f32 1e-06, %v2052_v3  ;;  %v2247_v43 = vadd.f32 1e-06, %v2059_v51  ;;  %v3092_v34 = vld [vmem:[#allocation36_spill] sm:$0xff]  ;;  %v1305_v3 = vpop.eup %1304  ;;  %1330 = vlog2.f32 %v2168_v32 }
  0x88   :  { %3086 = vst [vmem:[#allocation87_spill] sm:$0xff] %v2237_v29  ;;  %3087 = vst [vmem:[#allocation88_spill] sm:$0xff] %v2240_v2  ;;  %v2250_v46 = vadd.f32 1e-06, %v2063_v56  ;;  %v2253_v62 = vadd.f32 1e-06, %v2070_v20  ;;  %v1307_v20 = vpop.eup %1306  ;;  %1332 = vlog2.f32 %v2171_v15 }
  0x89   :  { %3088 = vst [vmem:[#allocation89_spill] sm:$0xff] %v2244_v30  ;;  %3089 = vst [vmem:[#allocation90_spill] sm:$0xff] %v2247_v43  ;;  %v2256_v39 = vadd.f32 1e-06, %v3092_v34  ;;  %v2259_v54 = vadd.f32 1e-06, %v2081_v48  ;;  %v1309_v17 = vpop.eup %1308  ;;  %1334 = vlog2.f32 %v2176_v33 }
  0x8a   :  { %3090 = vst [vmem:[#allocation91_spill] sm:$0xff] %v2250_v46  ;;  %3091 = vst [vmem:[#allocation92_spill] sm:$0xff] %v2253_v62  ;;  %v2263_v22 = vadd.f32 1e-06, %v3095_v45  ;;  %v2266_v51 = vadd.f32 1e-06, %v2092_v10  ;;  %v1311_v55 = vpop.eup %1310  ;;  %1336 = vlog2.f32 %v2179_v14 }
  0x8b   :  { %3093 = vst [vmem:[#allocation36_spill] sm:$0xff] %v2256_v39  ;;  %3094 = vst [vmem:[#allocation93_spill] sm:$0xff] %v2259_v54  ;;  %v2268_v56 = vmul.f32 0.6931472, %v1291_v4  ;;  %v3098_v52 = vld [vmem:[#allocation39_spill] sm:$0xff]  ;;  %v3104_v24 = vld [vmem:[#allocation46_spill] sm:$0xff]  ;;  %1338 = vlog2.f32 %v2184_v27 }
  0x8c   :  { %3096 = vst [vmem:[#allocation38_spill] sm:$0xff] %v2263_v22  ;;  %3097 = vst [vmem:[#allocation94_spill] sm:$0xff] %v2266_v51  ;;  %v2273_v18 = vadd.f32 1e-06, %v3098_v52  ;;  %v2275_v48 = vmul.f32 0.6931472, %v1293_v19  ;;  %1340 = vlog2.f32 %v2187_v58 }
  0x8d   :  { %v2277_v26 = vmul.f32 0.6931472, %v1295_v9  ;;  %v2281_v10 = vadd.f32 1e-06, %v2103_v7  ;;  %v2283_v4 = vmul.f32 0.6931472, %v1297_v40  ;;  %1342 = vlog2.f32 %v2192_v35 }
  0x8e   :  { %3099 = vst [vmem:[#allocation39_spill] sm:$0xff] %v2273_v18  ;;  %v2285_v6 = vmul.f32 0.6931472, %v1299_v1  ;;  %v2287_v42 = vmul.f32 0.6931472, %v1301_v49  ;;  %v3102_v7 = vld [vmem:[#allocation44_spill] sm:$0xff]  ;;  %v1313_v1 = vpop.eup %1312  ;;  %1344 = vlog2.f32 %v2195_v44 }
  0x8f   :  { %3100 = vst [vmem:[#allocation95_spill] sm:$0xff] %v2281_v10  ;;  %v2289_v34 = vmul.f32 0.6931472, %v1303_v63  ;;  %v2291_v52 = vmul.f32 0.6931472, %v1305_v3  ;;  %v579_v40 = vsub.f32 %v3102_v7, %v2268_v56  ;;  %v3103_v49 = vld [vmem:[#allocation45_spill] sm:$0xff]  ;;  %v581_v3 = vsub.f32 %v3104_v24, %v2277_v26 }
  0x90   :  { %v2295_v19 = vadd.f32 1e-06, %v2107_v13  ;;  %v2297_v9 = vmul.f32 0.6931472, %v1307_v20  ;;  %v2302_v45 = vmul.f32 0.6931472, %v1309_v17  ;;  %v580_v63 = vsub.f32 %v3103_v49, %v2275_v48  ;;  %v1315_v13 = vpop.eup %1314 }
  0x91   :  { %v2309_v61 = vmul.f32 0.6931472, %v1311_v55  ;;  %v3105_v11 = vld [vmem:[#allocation47_spill] sm:$0xff]  ;;  %v3106_v7 = vld [vmem:[#allocation48_spill] sm:$0xff]  ;;  %v1317_v50 = vpop.eup %1316  ;;  %v3107_v28 = vld [vmem:[#allocation49_spill] sm:$0xff]  ;;  %v585_v24 = vsub.f32 %v3108_v12, %v2289_v34  ;;  %1346 = vlog2.f32 %v2202_v57 }
  0x92   :  { %3101 = vst [vmem:[#allocation96_spill] sm:$0xff] %v2295_v19  ;;  %v582_v20 = vsub.f32 %v3105_v11, %v2283_v4  ;;  %v583_v17 = vsub.f32 %v3106_v7, %v2285_v6  ;;  %v584_v49 = vsub.f32 %v3107_v28, %v2287_v42  ;;  %v3109_v55 = vld [vmem:[#allocation51_spill] sm:$0xff]  ;;  %v2323_v31 = vmul.f32 0.6931472, %v1313_v1  ;;  %v3110_v16 = vld [vmem:[#allocation52_spill] sm:$0xff]  ;;  %v3111_v7 = vld [vmem:[#allocation13_spill] sm:$0xff]  ;;  %v1319_v32 = vpop.eup %1318 }
  0x93   :  { %v586_v60 = vsub.f32 %v3109_v55, %v2291_v52  ;;  %v587_v11 = vsub.f32 %v3110_v16, %v2297_v9  ;;  %v3112_v23 = vunpack.c.l.bf16 %v3111_v7  ;;  %v2330_v5 = vmul.f32 0.6931472, %v1315_v13  ;;  %v3113_v12 = vld [vmem:[#allocation53_spill] sm:$0xff]  ;;  %v1321_v36 = vpop.eup %1320  ;;  %v3115_v15 = vld [vmem:[#allocation54_spill] sm:$0xff]  ;;  %v3121_v14 = vld [vmem:[#allocation55_spill] sm:$0xff] }
  0x94   :  { %v588_v28 = vsub.f32 %v3113_v12, %v2302_v45  ;;  %v3114_v55 = vunpack.c.h.bf16 %v3111_v7  ;;  %v2337_v19 = vmul.f32 0.6931472, %v1317_v50  ;;  %v3119_v12 = vunpack.c.l.bf16 %v3111_v7  ;;  %v3122_v18 = vld [vmem:[#allocation15_spill] sm:$0xff]  ;;  %v1323_v27 = vpop.eup %1322  ;;  %v3127_v58 = vld [vmem:[#allocation57_spill] sm:$0xff]  ;;  %v3131_v35 = vld [vmem:[#allocation58_spill] sm:$0xff] }
  0x95   :  { %v628_v21 = vmul.f32 %v3112_v23, %v579_v40  ;;  %v3116_v23 = vld [vmem:[#allocation14_spill] sm:$0xff]  ;;  %v2358_v51 = vmul.f32 0.6931472, %v1321_v36  ;;  %v1325_v22 = vpop.eup %1324  ;;  %v2375_v46 = vmul.f32 0.6931472, %v1323_v27  ;;  %v3134_v44 = vld [vmem:[#allocation59_spill] sm:$0xff]  ;;  %1348 = vlog2.f32 %v2205_v38 }
  0x96   :  { %v629_v1 = vmul.f32 %v3114_v55, %v580_v63  ;;  %v3117_v40 = vunpack.c.l.bf16 %v3116_v23  ;;  %v3118_v33 = vunpack.c.h.bf16 %v3116_v23  ;;  %v726_v8 = vmul.f32 -1.953125e-05, %v3119_v12  ;;  %v1327_v54 = vpop.eup %1326  ;;  %v3135_v27 = vld [vmem:[#allocation17_spill] sm:$0xff]  ;;  %v3138_v57 = vld [vmem:[#allocation60_spill] sm:$0xff] }
  0x97   :  { %v3120_v63 = vmov %v3114_v55  ;;  %v2351_v55 = vmul.f32 0.6931472, %v1319_v32  ;;  %v3125_v12 = vunpack.c.h.bf16 %v3122_v18  ;;  %v3126_v32 = vunpack.c.l.bf16 %v3116_v23  ;;  %v3141_v38 = vld [vmem:[#allocation61_spill] sm:$0xff] }
  0x98   :  { %v630_v13 = vmul.f32 %v3117_v40, %v581_v3  ;;  %v631_v10 = vmul.f32 %v3118_v33, %v582_v20  ;;  %v727_v50 = vmul.f32 -1.953125e-05, %v3120_v63  ;;  %v3123_v3 = vunpack.c.l.bf16 %v3122_v18  ;;  %v3124_v20 = vld [vmem:[#allocation56_spill] sm:$0xff] }
  0x99   :  { %v633_v7 = vmul.f32 %v3125_v12, %v584_v49  ;;  %v728_v63 = vmul.f32 -1.953125e-05, %v3126_v32  ;;  %v677_v36 = vadd.f32 %v628_v21, %v2268_v56  ;;  %v678_v33 = vadd.f32 %v629_v1, %v2275_v48  ;;  %v1329_v32 = vpop.eup %1328 }
  0x9a   :  { %v632_v40 = vmul.f32 %v3123_v3, %v583_v17  ;;  %v3129_v17 = vunpack.c.l.bf16 %v3128_v25  ;;  %v3130_v39 = vunpack.c.h.bf16 %v3116_v23  ;;  %v775_v12 = vadd.f32 -3.9859694e-07, %v726_v8  ;;  %v1331_v21 = vpop.eup %1330 }
  0x9b   :  { %v776_v62 = vadd.f32 -3.9859694e-07, %v727_v50  ;;  %v2382_v56 = vmul.f32 0.6931472, %v1325_v22  ;;  %v679_v48 = vadd.f32 %v630_v13, %v2277_v26  ;;  %v777_v1 = vadd.f32 -3.9859694e-07, %v728_v63  ;;  %v1333_v23 = vpop.eup %1332 }
  0x9c   :  { %v634_v3 = vmul.f32 %v3129_v17, %v585_v24  ;;  %v729_v49 = vmul.f32 -1.953125e-05, %v3130_v39  ;;  %v3132_v24 = vunpack.c.h.bf16 %v3128_v25  ;;  %v3133_v39 = vunpack.c.l.bf16 %v3122_v18 }
  0x9d   :  { %v3136_v16 = vunpack.c.l.bf16 %v3135_v27  ;;  %v3137_v22 = vunpack.c.h.bf16 %v3122_v18  ;;  %v824_v13 = vmul.f32 %v775_v12, %v677_v36  ;;  %v825_v2 = vmul.f32 %v776_v62, %v678_v33 }
  0x9e   :  { %v635_v17 = vmul.f32 %v3132_v24, %v586_v60  ;;  %v730_v8 = vmul.f32 -1.953125e-05, %v3133_v39  ;;  %v680_v60 = vadd.f32 %v631_v10, %v2283_v4  ;;  %v1335_v24 = vpop.eup %1334  ;;  %v778_v26 = vadd.f32 -3.9859694e-07, %v729_v49 }
  0x9f   :  { %v636_v43 = vmul.f32 %v3136_v16, %v587_v11  ;;  %v731_v30 = vmul.f32 -1.953125e-05, %v3137_v22  ;;  %v1337_v39 = vpop.eup %1336  ;;  %v2395_v63 = vmul.f32 0.6931472, %v1327_v54  ;;  %v595_v50 = vsub.f32 %v3138_v57, %v2375_v46 }
  0xa0   :  { %v3139_v29 = vunpack.c.h.bf16 %v3135_v27  ;;  %v1339_v16 = vpop.eup %1338  ;;  %v681_v10 = vadd.f32 %v632_v40, %v2285_v6  ;;  %v3140_v18 = vunpack.c.l.bf16 %v3128_v25  ;;  %v779_v49 = vadd.f32 -3.9859694e-07, %v730_v8 }
  0xa1   :  { %v826_v36 = vmul.f32 %v777_v1, %v679_v48  ;;  %v2405_v62 = vpop.eup %1340  ;;  %v2407_v54 = vmul.f32 0.6931472, %v1329_v32  ;;  %1350 = vlog2.f32 %v2211_v59  ;;  %v596_v33 = vsub.f32 %v3141_v38, %v2382_v56  ;;  %v3144_v32 = vld [vmem:[#allocation18_spill] sm:$0xff] }
  0xa2   :  { %v637_v11 = vmul.f32 %v3139_v29, %v588_v28  ;;  %v732_v4 = vmul.f32 -1.953125e-05, %v3140_v18  ;;  %v682_v12 = vadd.f32 %v633_v7, %v2287_v42  ;;  %v3142_v29 = vunpack.c.h.bf16 %v3128_v25  ;;  %v2415_v18 = vpop.eup %1342  ;;  %v3182_v38 = vld [vmem:[#allocation22_spill] sm:$0xff] }
  0xa3   :  { %v780_v6 = vadd.f32 -3.9859694e-07, %v731_v30  ;;  %v827_v40 = vmul.f32 %v778_v26, %v680_v60  ;;  %v873_v22 = vadd.f32 %v825_v2, %v824_v13  ;;  %v2417_v48 = vmul.f32 0.6931472, %v1331_v21  ;;  %v2428_v26 = vpop.eup %1344 }
  0xa4   :  { %v733_v28 = vmul.f32 -1.953125e-05, %v3142_v29  ;;  %1352 = vlog2.f32 %v2214_v47  ;;  %v3143_v59 = vsub.f32 %v3115_v15, %v2309_v61  ;;  %v3145_v8 = vunpack.c.l.bf16 %v3144_v32  ;;  %v3147_v47 = vld [vmem:[#allocation62_spill] sm:$0xff] }
  0xa5   :  { %v683_v42 = vadd.f32 %v634_v3, %v2289_v34  ;;  %v3146_v25 = vunpack.c.l.bf16 %v3135_v27  ;;  %v781_v30 = vadd.f32 -3.9859694e-07, %v732_v4  ;;  %v828_v60 = vmul.f32 %v779_v49, %v681_v10 }
  0xa6   :  { %v638_v1 = vmul.f32 %v3145_v8, %v3143_v59  ;;  %v874_v2 = vadd.f32 %v873_v22, %v826_v36  ;;  %v2430_v21 = vmul.f32 0.6931472, %v1333_v23  ;;  %v597_v13 = vsub.f32 %v3147_v47, %v2395_v63  ;;  %v2442_v22 = vpop.eup %1346  ;;  %v3151_v23 = vld [vmem:[#allocation63_spill] sm:$0xff] }
  0xa7   :  { %v734_v7 = vmul.f32 -1.953125e-05, %v3146_v25  ;;  %v3148_v15 = vsub.f32 %v3121_v14, %v2323_v31  ;;  %v3149_v29 = vunpack.c.h.bf16 %v3144_v32  ;;  %v684_v34 = vadd.f32 %v635_v17, %v2291_v52  ;;  %v3153_v25 = vld [vmem:[#allocation19_spill] sm:$0xff] }
  0xa8   :  { %v3150_v3 = vunpack.c.h.bf16 %v3135_v27  ;;  %v782_v10 = vadd.f32 -3.9859694e-07, %v733_v28  ;;  %v829_v49 = vmul.f32 %v780_v6, %v682_v12  ;;  %v875_v36 = vadd.f32 %v874_v2, %v827_v40  ;;  %v2455_v40 = vpop.eup %1348  ;;  %v3156_v2 = vld [vmem:[#allocation64_spill] sm:$0xff] }
  0xa9   :  { %v639_v59 = vmul.f32 %v3149_v29, %v3148_v15  ;;  %1354 = vlog2.f32 %v2219_v53  ;;  %v598_v8 = vsub.f32 %v3151_v23, %v2407_v54  ;;  %v3152_v14 = vsub.f32 %v3124_v20, %v2330_v5  ;;  %v3189_v23 = vld [vmem:[#allocation23_spill] sm:$0xff] }
  0xaa   :  { %v735_v4 = vmul.f32 -1.953125e-05, %v3150_v3  ;;  %v3154_v15 = vunpack.c.l.bf16 %v3153_v25  ;;  %v685_v52 = vadd.f32 %v636_v43, %v2297_v9  ;;  %v3155_v17 = vunpack.c.l.bf16 %v3144_v32 }
  0xab   :  { %v783_v12 = vadd.f32 -3.9859694e-07, %v734_v7  ;;  %v830_v28 = vmul.f32 %v781_v30, %v683_v42  ;;  %v876_v6 = vadd.f32 %v875_v36, %v828_v60  ;;  %v2457_v53 = vmul.f32 0.6931472, %v1335_v24  ;;  %v2465_v7 = vpop.eup %1350  ;;  %v3163_v36 = vld [vmem:[#allocation20_spill] sm:$0xff] }
  0xac   :  { %v640_v29 = vmul.f32 %v3154_v15, %v3152_v14  ;;  %v736_v27 = vmul.f32 -1.953125e-05, %v3155_v17  ;;  %1356 = vlog2.f32 %v2222_v0  ;;  %v599_v20 = vsub.f32 %v3156_v2, %v2417_v48 }
  0xad   :  { %v686_v3 = vadd.f32 %v637_v11, %v2302_v45  ;;  %v3157_v14 = vunpack.c.h.bf16 %v3144_v32  ;;  %v784_v9 = vadd.f32 -3.9859694e-07, %v735_v4  ;;  %v831_v15 = vmul.f32 %v782_v10, %v684_v34 }
  0xae   :  { %v877_v17 = vadd.f32 %v876_v6, %v829_v49  ;;  %v2467_v42 = vmul.f32 0.6931472, %v1337_v39  ;;  %1358 = vlog2.f32 %v2227_v37  ;;  %v3158_v0 = vsub.f32 %v3127_v58, %v2337_v19  ;;  %v2478_v10 = vpop.eup %1352  ;;  %v3161_v37 = vld [vmem:[#allocation65_spill] sm:$0xff] }
  0xaf   :  { %v737_v43 = vmul.f32 -1.953125e-05, %v3157_v14  ;;  %v3159_v24 = vunpack.c.h.bf16 %v3153_v25  ;;  %v687_v45 = vadd.f32 %v638_v1, %v2309_v61  ;;  %v3160_v11 = vunpack.c.l.bf16 %v3153_v25 }
  0xb0   :  { %v785_v60 = vadd.f32 -3.9859694e-07, %v736_v27  ;;  %v832_v34 = vmul.f32 %v783_v12, %v685_v52  ;;  %v878_v4 = vadd.f32 %v877_v17, %v830_v28  ;;  %v2480_v39 = vmul.f32 0.6931472, %v1339_v16  ;;  %v3166_v16 = vld [vmem:[#allocation66_spill] sm:$0xff] }
  0xb1   :  { %v641_v30 = vmul.f32 %v3159_v24, %v3158_v0  ;;  %v738_v32 = vmul.f32 -1.953125e-05, %v3160_v11  ;;  %v600_v49 = vsub.f32 %v3161_v37, %v2430_v21  ;;  %v3162_v58 = vsub.f32 %v3131_v35, %v2351_v55  ;;  %v3197_v37 = vld [vmem:[#allocation24_spill] sm:$0xff] }
  0xb2   :  { %v3164_v6 = vunpack.c.l.bf16 %v3163_v36  ;;  %v688_v61 = vadd.f32 %v639_v59, %v2323_v31  ;;  %v3165_v1 = vmov %v3159_v24  ;;  %v786_v52 = vadd.f32 -3.9859694e-07, %v737_v43 }
  0xb3   :  { %v739_v27 = vmul.f32 -1.953125e-05, %v3165_v1  ;;  %v833_v12 = vmul.f32 %v784_v9, %v686_v3  ;;  %v879_v28 = vadd.f32 %v878_v4, %v831_v15  ;;  %1360 = vlog2.f32 %v2230_v41  ;;  %v2503_v9 = vpop.eup %1354  ;;  %v3170_v15 = vld [vmem:[#allocation87_spill] sm:$0xff] }
  0xb4   :  { %v642_v14 = vmul.f32 %v3164_v6, %v3162_v58  ;;  %v601_v17 = vsub.f32 %v3166_v16, %v2457_v53  ;;  %v3167_v0 = vsub.f32 %v3134_v44, %v2358_v51  ;;  %v3168_v35 = vunpack.c.h.bf16 %v3163_v36  ;;  %v3171_v44 = vld [vmem:[#allocation67_spill] sm:$0xff] }
  0xb5   :  { %v689_v11 = vadd.f32 %v640_v29, %v2330_v5  ;;  %v3169_v31 = vmov %v3164_v6  ;;  %v787_v25 = vadd.f32 -3.9859694e-07, %v738_v32  ;;  %v834_v43 = vmul.f32 %v785_v60, %v687_v45 }
  0xb6   :  { %v643_v24 = vmul.f32 %v3168_v35, %v3167_v0  ;;  %v740_v59 = vmul.f32 -1.953125e-05, %v3169_v31  ;;  %v880_v3 = vadd.f32 %v879_v28, %v832_v34  ;;  %v2506_v41 = vmul.f32 0.6931472, %v2405_v62  ;;  %v2514_v45 = vpop.eup %1356  ;;  %v3173_v62 = vld [vmem:[#allocation88_spill] sm:$0xff]  ;;  %v3174_v34 = vld [vmem:[#allocation21_spill] sm:$0xff] }
  0xb7   :  { %1362 = vlog2.f32 %v3170_v15  ;;  %v602_v4 = vsub.f32 %v3171_v44, %v2467_v42  ;;  %v690_v58 = vadd.f32 %v641_v30, %v2337_v19  ;;  %v3172_v5 = vmov %v3168_v35  ;;  %v3177_v35 = vld [vmem:[#allocation35_spill] sm:$0xff] }
  0xb8   :  { %v741_v29 = vmul.f32 -1.953125e-05, %v3172_v5  ;;  %v788_v6 = vadd.f32 -3.9859694e-07, %v739_v27  ;;  %v835_v1 = vmul.f32 %v786_v52, %v688_v61  ;;  %v881_v32 = vadd.f32 %v880_v3, %v833_v12  ;;  %v2528_v12 = vpop.eup %1358  ;;  %v3180_v3 = vld [vmem:[#allocation89_spill] sm:$0xff] }
  0xb9   :  { %v2517_v60 = vmul.f32 0.6931472, %v2415_v18  ;;  %1364 = vlog2.f32 %v3173_v62  ;;  %v3175_v28 = vunpack.c.l.bf16 %v3174_v34  ;;  %v691_v19 = vadd.f32 %v642_v14, %v2351_v55 }
  0xba   :  { %v789_v61 = vadd.f32 -3.9859694e-07, %v740_v59  ;;  %v836_v27 = vmul.f32 %v787_v25, %v689_v11  ;;  %v882_v52 = vadd.f32 %v881_v32, %v834_v43  ;;  %v2531_v18 = vmul.f32 0.6931472, %v2428_v26  ;;  %v3181_v26 = vld [vmem:[#allocation11_spill] sm:$0xff] }
  0xbb   :  { %v644_v0 = vmul.f32 %v3175_v28, %v595_v50  ;;  %v3176_v30 = vmov %v3175_v28  ;;  %v603_v31 = vsub.f32 %v3177_v35, %v2480_v39  ;;  %v3178_v50 = vunpack.c.h.bf16 %v3174_v34  ;;  %v3185_v34 = vld [vmem:[#allocation90_spill] sm:$0xff] }
  0xbc   :  { %v742_v36 = vmul.f32 -1.953125e-05, %v3176_v30  ;;  %v692_v57 = vadd.f32 %v643_v24, %v2358_v51  ;;  %v790_v59 = vadd.f32 -3.9859694e-07, %v741_v29  ;;  %v837_v25 = vmul.f32 %v788_v6, %v690_v58 }
  0xbd   :  { %v645_v55 = vmul.f32 %v3178_v50, %v596_v33  ;;  %v3179_v14 = vmov %v3178_v50  ;;  %v883_v43 = vadd.f32 %v882_v52, %v835_v1  ;;  %1366 = vlog2.f32 %v3180_v3  ;;  %v2554_v6 = vpop.eup %1360 }
  0xbe   :  { %v743_v11 = vmul.f32 -1.953125e-05, %v3179_v14  ;;  %v604_v15 = vsub.f32 %v3181_v26, %v2506_v41  ;;  %v3183_v5 = vunpack.c.l.bf16 %v3182_v38  ;;  %v693_v33 = vadd.f32 %v644_v0, %v2375_v46 }
  0xbf   :  { %v791_v62 = vadd.f32 -3.9859694e-07, %v742_v36  ;;  %v838_v29 = vmul.f32 %v789_v61, %v691_v19  ;;  %v884_v58 = vadd.f32 %v883_v43, %v836_v27  ;;  %v2557_v1 = vmul.f32 0.6931472, %v2442_v22  ;;  %v3188_v27 = vld [vmem:[#allocation12_spill] sm:$0xff] }
  0xc0   :  { %v646_v32 = vmul.f32 %v3183_v5, %v597_v13  ;;  %v3184_v51 = vmov %v3183_v5  ;;  %1368 = vlog2.f32 %v3185_v34  ;;  %v3186_v47 = vunpack.c.h.bf16 %v3182_v38 }
  0xc1   :  { %v744_v24 = vmul.f32 -1.953125e-05, %v3184_v51  ;;  %v694_v46 = vadd.f32 %v645_v55, %v2382_v56  ;;  %v792_v19 = vadd.f32 -3.9859694e-07, %v743_v11  ;;  %v839_v30 = vmul.f32 %v790_v59, %v692_v57  ;;  %v2568_v61 = vpop.eup %1362  ;;  %v3196_v51 = vld [vmem:[#allocation92_spill] sm:$0xff] }
  0xc2   :  { %v647_v13 = vmul.f32 %v3186_v47, %v598_v8  ;;  %v3187_v28 = vmov %v3186_v47  ;;  %v885_v36 = vadd.f32 %v884_v58, %v837_v25  ;;  %v2571_v22 = vmul.f32 0.6931472, %v2455_v40  ;;  %v3192_v40 = vld [vmem:[#allocation91_spill] sm:$0xff]  ;;  %v3193_v25 = vld [vmem:[#allocation37_spill] sm:$0xff] }
  0xc3   :  { %v745_v0 = vmul.f32 -1.953125e-05, %v3187_v28  ;;  %v605_v52 = vsub.f32 %v3188_v27, %v2517_v60  ;;  %v3190_v8 = vunpack.c.l.bf16 %v3189_v23  ;;  %v695_v35 = vadd.f32 %v646_v32, %v2395_v63  ;;  %v2583_v59 = vpop.eup %1364 }
  0xc4   :  { %v793_v57 = vadd.f32 -3.9859694e-07, %v744_v24  ;;  %v840_v14 = vmul.f32 %v791_v62, %v693_v33  ;;  %v886_v11 = vadd.f32 %v885_v36, %v838_v29  ;;  %1370 = vlog2.f32 %v3192_v40 }
  0xc5   :  { %v648_v56 = vmul.f32 %v3190_v8, %v599_v20  ;;  %v3191_v50 = vmov %v3190_v8  ;;  %v606_v43 = vsub.f32 %v3193_v25, %v2531_v18  ;;  %v3194_v2 = vunpack.c.h.bf16 %v3189_v23  ;;  %v3204_v8 = vld [vmem:[#allocation69_spill] sm:$0xff] }
  0xc6   :  { %v746_v55 = vmul.f32 -1.953125e-05, %v3191_v50  ;;  %v696_v63 = vadd.f32 %v647_v13, %v2407_v54  ;;  %v794_v38 = vadd.f32 -3.9859694e-07, %v745_v0  ;;  %v841_v5 = vmul.f32 %v792_v19, %v694_v46  ;;  %v3200_v46 = vld [vmem:[#allocation68_spill] sm:$0xff]  ;;  %v3208_v25 = vld [vmem:[#allocation93_spill] sm:$0xff] }
  0xc7   :  { %v649_v20 = vmul.f32 %v3194_v2, %v600_v49  ;;  %v3195_v3 = vmov %v3194_v2  ;;  %v887_v32 = vadd.f32 %v886_v11, %v839_v30  ;;  %v2597_v33 = vmul.f32 0.6931472, %v2465_v7  ;;  %v2608_v13 = vpop.eup %1366 }
  0xc8   :  { %v747_v26 = vmul.f32 -1.953125e-05, %v3195_v3  ;;  %1372 = vlog2.f32 %v3196_v51  ;;  %v3198_v24 = vunpack.c.l.bf16 %v3197_v37  ;;  %v697_v49 = vadd.f32 %v648_v56, %v2417_v48 }
  0xc9   :  { %v795_v58 = vadd.f32 -3.9859694e-07, %v746_v55  ;;  %v842_v34 = vmul.f32 %v793_v57, %v695_v35  ;;  %v888_v47 = vadd.f32 %v887_v32, %v840_v14  ;;  %v2611_v7 = vmul.f32 0.6931472, %v2478_v10  ;;  %v3203_v10 = vld [vmem:[#allocation36_spill] sm:$0xff]  ;;  %v3205_v35 = vld [vmem:[#allocation25_spill] sm:$0xff] }
  0xca   :  { %v650_v62 = vmul.f32 %v3198_v24, %v601_v17  ;;  %v3199_v54 = vmov %v3198_v24  ;;  %v607_v28 = vsub.f32 %v3200_v46, %v2557_v1  ;;  %v3201_v16 = vunpack.c.h.bf16 %v3197_v37  ;;  %v2623_v23 = vpop.eup %1368  ;;  %v3212_v37 = vld [vmem:[#allocation26_spill] sm:$0xff] }
  0xcb   :  { %v748_v29 = vmul.f32 -1.953125e-05, %v3199_v54  ;;  %v698_v17 = vadd.f32 %v649_v20, %v2430_v21  ;;  %v796_v30 = vadd.f32 -3.9859694e-07, %v747_v26  ;;  %v843_v36 = vmul.f32 %v794_v38, %v696_v63 }
  0xcc   :  { %v651_v48 = vmul.f32 %v3201_v16, %v602_v4  ;;  %v3202_v0 = vmov %v3201_v16  ;;  %v889_v27 = vadd.f32 %v888_v47, %v841_v5  ;;  %1374 = vlog2.f32 %v3203_v10  ;;  %v3215_v47 = vld [vmem:[#allocation38_spill] sm:$0xff]  ;;  %v3220_v10 = vld [vmem:[#allocation27_spill] sm:$0xff] }
  0xcd   :  { %v749_v19 = vmul.f32 -1.953125e-05, %v3202_v0  ;;  %v608_v56 = vsub.f32 %v3204_v8, %v2571_v22  ;;  %v3206_v44 = vunpack.c.l.bf16 %v3205_v35  ;;  %v699_v4 = vadd.f32 %v650_v62, %v2457_v53 }
  0xce   :  { %v797_v57 = vadd.f32 -3.9859694e-07, %v748_v29  ;;  %v844_v14 = vmul.f32 %v795_v58, %v697_v49  ;;  %v890_v11 = vadd.f32 %v889_v27, %v842_v34  ;;  %v2634_v40 = vmul.f32 0.6931472, %v2503_v9  ;;  %v2642_v5 = vpop.eup %1370  ;;  %v3211_v9 = vld [vmem:[#allocation40_spill] sm:$0xff]  ;;  %v3219_v27 = vld [vmem:[#allocation94_spill] sm:$0xff] }
  0xcf   :  { %v652_v50 = vmul.f32 %v3206_v44, %v603_v31  ;;  %v3207_v21 = vmov %v3206_v44  ;;  %1376 = vlog2.f32 %v3208_v25  ;;  %v3209_v2 = vunpack.c.h.bf16 %v3205_v35 }
  0xd0   :  { %v750_v55 = vmul.f32 -1.953125e-05, %v3207_v21  ;;  %v700_v63 = vadd.f32 %v651_v48, %v2467_v42  ;;  %v798_v53 = vadd.f32 -3.9859694e-07, %v749_v19  ;;  %v845_v26 = vmul.f32 %v796_v30, %v698_v17 }
  0xd1   :  { %v653_v20 = vmul.f32 %v3209_v2, %v604_v15  ;;  %v3210_v31 = vmov %v3209_v2  ;;  %v891_v38 = vadd.f32 %v890_v11, %v843_v36  ;;  %v2645_v32 = vmul.f32 0.6931472, %v2514_v45  ;;  %v3216_v45 = vld [vmem:[#allocation41_spill] sm:$0xff] }
  0xd2   :  { %v751_v3 = vmul.f32 -1.953125e-05, %v3210_v31  ;;  %v609_v51 = vsub.f32 %v3211_v9, %v2597_v33  ;;  %v3213_v24 = vunpack.c.l.bf16 %v3212_v37  ;;  %v701_v15 = vadd.f32 %v652_v50, %v2480_v39  ;;  %v2654_v34 = vpop.eup %1372 }
  0xd3   :  { %v799_v54 = vadd.f32 -3.9859694e-07, %v750_v55  ;;  %v846_v29 = vmul.f32 %v797_v57, %v699_v4  ;;  %v892_v58 = vadd.f32 %v891_v38, %v844_v14  ;;  %1378 = vlog2.f32 %v3215_v47  ;;  %v3228_v38 = vld [vmem:[#allocation28_spill] sm:$0xff] }
  0xd4   :  { %v654_v62 = vmul.f32 %v3213_v24, %v605_v52  ;;  %v3214_v42 = vmov %v3213_v24  ;;  %v610_v46 = vsub.f32 %v3216_v45, %v2611_v7  ;;  %v3217_v16 = vunpack.c.h.bf16 %v3212_v37 }
  0xd5   :  { %v752_v49 = vmul.f32 -1.953125e-05, %v3214_v42  ;;  %v702_v52 = vadd.f32 %v653_v20, %v2506_v41  ;;  %v800_v0 = vadd.f32 -3.9859694e-07, %v751_v3  ;;  %v847_v19 = vmul.f32 %v798_v53, %v700_v63  ;;  %v3226_v53 = vld [vmem:[#allocation39_spill] sm:$0xff] }
  0xd6   :  { %v655_v48 = vmul.f32 %v3217_v16, %v606_v43  ;;  %v3218_v39 = vmov %v3217_v16  ;;  %v893_v30 = vadd.f32 %v892_v58, %v845_v26  ;;  %v2665_v36 = vmul.f32 0.6931472, %v2528_v12  ;;  %v2673_v55 = vpop.eup %1374  ;;  %v3223_v12 = vld [vmem:[#allocation42_spill] sm:$0xff] }
  0xd7   :  { %v753_v17 = vmul.f32 -1.953125e-05, %v3218_v39  ;;  %1380 = vlog2.f32 %v3219_v27  ;;  %v3221_v8 = vunpack.c.l.bf16 %v3220_v10  ;;  %v703_v44 = vadd.f32 %v654_v62, %v2517_v60 }
  0xd8   :  { %v801_v41 = vadd.f32 -3.9859694e-07, %v752_v49  ;;  %v848_v4 = vmul.f32 %v799_v54, %v701_v15  ;;  %v894_v21 = vadd.f32 %v893_v30, %v846_v29  ;;  %v2676_v57 = vmul.f32 0.6931472, %v2554_v6  ;;  %v3227_v6 = vld [vmem:[#allocation70_spill] sm:$0xff]  ;;  %v3231_v54 = vld [vmem:[#allocation95_spill] sm:$0xff] }
  0xd9   :  { %v656_v35 = vmul.f32 %v3221_v8, %v607_v28  ;;  %v3222_v43 = vmov %v3221_v8  ;;  %v611_v14 = vsub.f32 %v3223_v12, %v2634_v40  ;;  %v3224_v11 = vunpack.c.h.bf16 %v3220_v10  ;;  %v2685_v3 = vpop.eup %1376 }
  0xda   :  { %v754_v50 = vmul.f32 -1.953125e-05, %v3222_v43  ;;  %v704_v28 = vadd.f32 %v655_v48, %v2531_v18  ;;  %v802_v20 = vadd.f32 -3.9859694e-07, %v753_v17  ;;  %v849_v63 = vmul.f32 %v800_v0, %v702_v52  ;;  %v3235_v0 = vld [vmem:[#allocation29_spill] sm:$0xff]  ;;  %v3238_v43 = vld [vmem:[#allocation96_spill] sm:$0xff] }
  0xdb   :  { %v657_v25 = vmul.f32 %v3224_v11, %v608_v56  ;;  %v3225_v60 = vmov %v3224_v11  ;;  %v895_v31 = vadd.f32 %v894_v21, %v847_v19  ;;  %1382 = vlog2.f32 %v3226_v53 }
  0xdc   :  { %v755_v2 = vmul.f32 -1.953125e-05, %v3225_v60  ;;  %v612_v26 = vsub.f32 %v3227_v6, %v2645_v32  ;;  %v3229_v9 = vunpack.c.l.bf16 %v3228_v38  ;;  %v705_v56 = vadd.f32 %v656_v35, %v2557_v1  ;;  %v3242_v60 = vld [vmem:[#allocation72_spill] sm:$0xff] }
  0xdd   :  { %v803_v62 = vadd.f32 -3.9859694e-07, %v754_v50  ;;  %v850_v15 = vmul.f32 %v801_v41, %v703_v44  ;;  %v896_v42 = vadd.f32 %v895_v31, %v848_v4  ;;  %v2696_v49 = vmul.f32 0.6931472, %v2568_v61  ;;  %v2704_v52 = vpop.eup %1378  ;;  %v3234_v61 = vld [vmem:[#allocation43_spill] sm:$0xff] }
  0xde   :  { %v658_v37 = vmul.f32 %v3229_v9, %v609_v51  ;;  %v3230_v18 = vmov %v3229_v9  ;;  %1384 = vlog2.f32 %v3231_v54  ;;  %v3232_v29 = vunpack.c.h.bf16 %v3228_v38 }
  0xdf   :  { %v756_v24 = vmul.f32 -1.953125e-05, %v3230_v18  ;;  %v706_v47 = vadd.f32 %v657_v25, %v2571_v22  ;;  %v804_v1 = vadd.f32 -3.9859694e-07, %v755_v2  ;;  %v851_v16 = vmul.f32 %v802_v20, %v704_v28  ;;  %v3243_v20 = vld [vmem:[#allocation30_spill] sm:$0xff]  ;;  %v3246_v18 = vld [vmem:[#allocation73_spill] sm:$0xff] }
  0xe0   :  { %v659_v58 = vmul.f32 %v3232_v29, %v610_v46  ;;  %v3233_v51 = vmov %v3232_v29  ;;  %v897_v48 = vadd.f32 %v896_v42, %v849_v63  ;;  %v2707_v39 = vmul.f32 0.6931472, %v2583_v59  ;;  %v3239_v59 = vld [vmem:[#allocation71_spill] sm:$0xff] }
  0xe1   :  { %v757_v45 = vmul.f32 -1.953125e-05, %v3233_v51  ;;  %v613_v17 = vsub.f32 %v3234_v61, %v2665_v36  ;;  %v3236_v19 = vunpack.c.l.bf16 %v3235_v0  ;;  %v707_v46 = vadd.f32 %v658_v37, %v2597_v33  ;;  %v2716_v44 = vpop.eup %1380 }
  0xe2   :  { %v805_v10 = vadd.f32 -3.9859694e-07, %v756_v24  ;;  %v852_v8 = vmul.f32 %v803_v62, %v705_v56  ;;  %v898_v35 = vadd.f32 %v897_v48, %v850_v15  ;;  %1386 = vlog2.f32 %v3238_v43 }
  0xe3   :  { %v660_v30 = vmul.f32 %v3236_v19, %v611_v14  ;;  %v3237_v22 = vmov %v3236_v19  ;;  %v614_v50 = vsub.f32 %v3239_v59, %v2676_v57  ;;  %v3240_v41 = vunpack.c.h.bf16 %v3235_v0 }
  0xe4   :  { %v758_v27 = vmul.f32 -1.953125e-05, %v3237_v22  ;;  %v708_v21 = vadd.f32 %v659_v58, %v2611_v7  ;;  %v806_v14 = vadd.f32 -3.9859694e-07, %v757_v45  ;;  %v853_v11 = vmul.f32 %v804_v1, %v706_v47  ;;  %v3249_v45 = vld [vmem:[#allocation74_spill] sm:$0xff]  ;;  %v3253_v22 = vld [vmem:[#allocation75_spill] sm:$0xff] }
  0xe5   :  { %v661_v4 = vmul.f32 %v3240_v41, %v612_v26  ;;  %v3241_v33 = vmov %v3240_v41  ;;  %v899_v25 = vadd.f32 %v898_v35, %v851_v16  ;;  %v558_v28 = vmul.f32 0.6931472, %v2608_v13  ;;  %v1383_v37 = vpop.eup %1382 }
  0xe6   :  { %v759_v12 = vmul.f32 -1.953125e-05, %v3241_v33  ;;  %v615_v2 = vsub.f32 %v3242_v60, %v2696_v49  ;;  %v3244_v63 = vunpack.c.l.bf16 %v3243_v20  ;;  %v709_v53 = vadd.f32 %v660_v30, %v2634_v40 }
  0xe7   :  { %v807_v7 = vadd.f32 -3.9859694e-07, %v758_v27  ;;  %v854_v38 = vmul.f32 %v805_v10, %v707_v46  ;;  %v900_v9 = vadd.f32 %v899_v25, %v852_v8  ;;  %v560_v56 = vmul.f32 0.6931472, %v2623_v23  ;;  %v3250_v23 = vld [vmem:[#allocation31_spill] sm:$0xff] }
  0xe8   :  { %v662_v31 = vmul.f32 %v3244_v63, %v613_v17  ;;  %v3245_v6 = vmov %v3244_v63  ;;  %v616_v13 = vsub.f32 %v3246_v18, %v2707_v39  ;;  %v3247_v24 = vunpack.c.h.bf16 %v3243_v20  ;;  %v1385_v47 = vpop.eup %1384 }
  0xe9   :  { %v760_v26 = vmul.f32 -1.953125e-05, %v3245_v6  ;;  %v710_v15 = vadd.f32 %v661_v4, %v2645_v32  ;;  %v808_v54 = vadd.f32 -3.9859694e-07, %v759_v12  ;;  %v855_v29 = vmul.f32 %v806_v14, %v708_v21  ;;  %v3256_v21 = vld [vmem:[#allocation76_spill] sm:$0xff] }
  0xea   :  { %v663_v62 = vmul.f32 %v3247_v24, %v614_v50  ;;  %v3248_v42 = vmov %v3247_v24  ;;  %v901_v58 = vadd.f32 %v900_v9, %v853_v11  ;;  %v562_v51 = vmul.f32 0.6931472, %v2642_v5  ;;  %v3257_v12 = vld [vmem:[#allocation32_spill] sm:$0xff]  ;;  %v3263_v24 = vld [vmem:[#allocation78_spill] sm:$0xff] }
  0xeb   :  { %v761_v40 = vmul.f32 -1.953125e-05, %v3248_v42  ;;  %v617_v1 = vsub.f32 %v3249_v45, %v558_v28  ;;  %v3251_v16 = vunpack.c.l.bf16 %v3250_v23  ;;  %v711_v61 = vadd.f32 %v662_v31, %v2665_v36  ;;  %v3260_v31 = vld [vmem:[#allocation77_spill] sm:$0xff] }
  0xec   :  { %v809_v32 = vadd.f32 -3.9859694e-07, %v760_v26  ;;  %v856_v19 = vmul.f32 %v807_v7, %v709_v53  ;;  %v902_v30 = vadd.f32 %v901_v58, %v854_v38  ;;  %v564_v46 = vmul.f32 0.6931472, %v2654_v34  ;;  %v1387_v41 = vpop.eup %1386 }
  0xed   :  { %v664_v48 = vmul.f32 %v3251_v16, %v615_v2  ;;  %v3252_v17 = vmov %v3251_v16  ;;  %v618_v27 = vsub.f32 %v3253_v22, %v560_v56  ;;  %v3254_v10 = vunpack.c.h.bf16 %v3250_v23  ;;  %v3267_v23 = vld [vmem:[#allocation79_spill] sm:$0xff]  ;;  %v3270_v22 = vld [vmem:[#allocation81_spill] sm:$0xff] }
  0xee   :  { %v762_v0 = vmul.f32 -1.953125e-05, %v3252_v17  ;;  %v712_v8 = vadd.f32 %v663_v62, %v2676_v57  ;;  %v810_v59 = vadd.f32 -3.9859694e-07, %v761_v40  ;;  %v857_v36 = vmul.f32 %v808_v54, %v710_v15  ;;  %v3264_v15 = vld [vmem:[#allocation33_spill] sm:$0xff] }
  0xef   :  { %v665_v5 = vmul.f32 %v3254_v10, %v616_v13  ;;  %v3255_v35 = vmov %v3254_v10  ;;  %v903_v50 = vadd.f32 %v902_v30, %v855_v29  ;;  %v566_v4 = vmul.f32 0.6931472, %v2673_v55  ;;  %v3271_v10 = vld [vmem:[#allocation34_spill] sm:$0xff] }
  0xf0   :  { %v763_v43 = vmul.f32 -1.953125e-05, %v3255_v35  ;;  %v619_v33 = vsub.f32 %v3256_v21, %v562_v51  ;;  %v3258_v34 = vunpack.c.l.bf16 %v3257_v12  ;;  %v713_v11 = vadd.f32 %v664_v48, %v2696_v49  ;;  %v3274_v21 = vld [vmem:[#allocation82_spill] sm:$0xff] }
  0xf1   :  { %v811_v57 = vadd.f32 -3.9859694e-07, %v762_v0  ;;  %v858_v2 = vmul.f32 %v809_v32, %v711_v61  ;;  %v904_v20 = vadd.f32 %v903_v50, %v856_v19  ;;  %v568_v63 = vmul.f32 0.6931472, %v2685_v3 }
  0xf2   :  { %v666_v14 = vmul.f32 %v3258_v34, %v617_v1  ;;  %v3259_v25 = vmov %v3258_v34  ;;  %v620_v53 = vsub.f32 %v3260_v31, %v564_v46  ;;  %v3261_v6 = vunpack.c.h.bf16 %v3257_v12  ;;  %v3278_v31 = vld [vmem:[#allocation80_spill] sm:$0xff] }
  0xf3   :  { %v764_v60 = vmul.f32 -1.953125e-05, %v3259_v25  ;;  %v714_v26 = vadd.f32 %v665_v5, %v2707_v39  ;;  %v812_v9 = vadd.f32 -3.9859694e-07, %v763_v43  ;;  %v859_v49 = vmul.f32 %v810_v59, %v712_v8 }
  0xf4   :  { %v667_v55 = vmul.f32 %v3261_v6, %v618_v27  ;;  %v3262_v7 = vmov %v3261_v6  ;;  %v905_v18 = vadd.f32 %v904_v20, %v857_v36  ;;  %v570_v13 = vmul.f32 0.6931472, %v2704_v52 }
  0xf5   :  { %v765_v38 = vmul.f32 -1.953125e-05, %v3262_v7  ;;  %v621_v62 = vsub.f32 %v3263_v24, %v566_v4  ;;  %v3265_v42 = vunpack.c.l.bf16 %v3264_v15  ;;  %v715_v40 = vadd.f32 %v666_v14, %v558_v28  ;;  %v3282_v24 = vld [vmem:[#allocation84_spill] sm:$0xff] }
  0xf6   :  { %v813_v58 = vadd.f32 -3.9859694e-07, %v764_v60  ;;  %v860_v45 = vmul.f32 %v811_v57, %v713_v11  ;;  %v906_v39 = vadd.f32 %v905_v18, %v858_v2  ;;  %v572_v1 = vmul.f32 0.6931472, %v2716_v44  ;;  %v3277_v2 = vld [vmem:[#allocation83_spill] sm:$0xff] }
  0xf7   :  { %v668_v3 = vmul.f32 %v3265_v42, %v619_v33  ;;  %v3266_v54 = vmov %v3265_v42  ;;  %v622_v16 = vsub.f32 %v3267_v23, %v568_v63  ;;  %v3268_v48 = vunpack.c.h.bf16 %v3264_v15 }
  0xf8   :  { %v766_v29 = vmul.f32 -1.953125e-05, %v3266_v54  ;;  %v716_v52 = vadd.f32 %v667_v55, %v560_v56  ;;  %v814_v32 = vadd.f32 -3.9859694e-07, %v765_v38  ;;  %v861_v19 = vmul.f32 %v812_v9, %v714_v26 }
  0xf9   :  { %v669_v61 = vmul.f32 %v3268_v48, %v620_v53  ;;  %v3269_v17 = vmov %v3268_v48  ;;  %v907_v28 = vadd.f32 %v906_v39, %v859_v49  ;;  %v574_v30 = vmul.f32 0.6931472, %v1383_v37  ;;  %v3281_v49 = vld [vmem:[#allocation85_spill] sm:$0xff] }
  0xfa   :  { %v767_v0 = vmul.f32 -1.953125e-05, %v3269_v17  ;;  %v623_v27 = vsub.f32 %v3270_v22, %v570_v13  ;;  %v3272_v5 = vunpack.c.l.bf16 %v3271_v10  ;;  %v717_v35 = vadd.f32 %v668_v3, %v562_v51 }
  0xfb   :  { %v815_v59 = vadd.f32 -3.9859694e-07, %v766_v29  ;;  %v862_v36 = vmul.f32 %v813_v58, %v715_v40  ;;  %v908_v50 = vadd.f32 %v907_v28, %v860_v45  ;;  %v576_v56 = vmul.f32 0.6931472, %v1385_v47  ;;  %v186_v47 = vld [vmem:[#allocation5 + $0xc0] sm:$0xf] }
  0xfc   :  { %v670_v8 = vmul.f32 %v3272_v5, %v621_v62  ;;  %v3273_v44 = vmov %v3272_v5  ;;  %v624_v33 = vsub.f32 %v3274_v21, %v572_v1  ;;  %v3275_v12 = vunpack.c.h.bf16 %v3271_v10  ;;  %v3285_v45 = vld [vmem:[#allocation86_spill] sm:$0xff] }
  0xfd   :  { %v768_v43 = vmul.f32 -1.953125e-05, %v3273_v44  ;;  %v718_v14 = vadd.f32 %v669_v61, %v564_v46  ;;  %v816_v25 = vadd.f32 -3.9859694e-07, %v767_v0  ;;  %v863_v60 = vmul.f32 %v814_v32, %v716_v52 }
  0xfe   :  { %v671_v34 = vmul.f32 %v3275_v12, %v622_v16  ;;  %v3276_v37 = vmov %v3275_v12  ;;  %v909_v57 = vadd.f32 %v908_v50, %v861_v19  ;;  %v578_v51 = vmul.f32 0.6931472, %v1387_v41 }
  0xff   :  { %v769_v11 = vmul.f32 -1.953125e-05, %v3276_v37  ;;  %v625_v20 = vsub.f32 %v3277_v2, %v574_v30  ;;  %v3279_v53 = vunpack.c.l.bf16 %v3278_v31  ;;  %v719_v55 = vadd.f32 %v670_v8, %v566_v4 }
 0x100   :  { %v817_v38 = vadd.f32 -3.9859694e-07, %v768_v43  ;;  %v864_v9 = vmul.f32 %v815_v59, %v717_v35  ;;  %v910_v46 = vadd.f32 %v909_v57, %v862_v36  ;;  %v1138_v18 = vunpack.c.h.bf16 %v3281_v49 }
 0x101   :  { %v672_v6 = vmul.f32 %v3279_v53, %v623_v27  ;;  %v3280_v26 = vmov %v3279_v53  ;;  %v626_v62 = vsub.f32 %v3282_v24, %v576_v56  ;;  %v3283_v15 = vunpack.c.h.bf16 %v3278_v31 }
 0x102   :  { %v770_v7 = vmul.f32 -1.953125e-05, %v3280_v26  ;;  %v720_v42 = vadd.f32 %v671_v34, %v568_v63  ;;  %v818_v54 = vadd.f32 -3.9859694e-07, %v769_v11  ;;  %v865_v4 = vmul.f32 %v816_v25, %v718_v14 }
 0x103   :  { %v673_v41 = vmul.f32 %v3283_v15, %v624_v33  ;;  %v3284_v3 = vmov %v3283_v15  ;;  %v911_v29 = vadd.f32 %v910_v46, %v863_v60  ;;  %v235_v58 = vunpack.c.l.bf16 %v186_v47 }
 0x104   :  { %v771_v40 = vmul.f32 -1.953125e-05, %v3284_v3  ;;  %v627_v39 = vsub.f32 %v3285_v45, %v578_v51  ;;  %v3286_v23 = vunpack.c.l.bf16 %v3281_v49  ;;  %v721_v48 = vadd.f32 %v672_v6, %v570_v13 }
 0x105   :  { %v819_v17 = vadd.f32 -3.9859694e-07, %v770_v7  ;;  %v866_v0 = vmul.f32 %v817_v38, %v719_v55  ;;  %v912_v32 = vadd.f32 %v911_v29, %v864_v9  ;;  %v675_v63 = vmul.f32 %v1138_v18, %v626_v62 }
 0x106   :  { %v674_v16 = vmul.f32 %v3286_v23, %v625_v20  ;;  %v3287_v61 = vmov %v3286_v23  ;;  %v722_v19 = vadd.f32 %v673_v41, %v572_v1  ;;  %v773_v28 = vmul.f32 -1.953125e-05, %v1138_v18 }
 0x107   :  { %v772_v52 = vmul.f32 -1.953125e-05, %v3287_v61  ;;  %v820_v22 = vadd.f32 -3.9859694e-07, %v771_v40  ;;  %v867_v27 = vmul.f32 %v818_v54, %v720_v42  ;;  %v913_v10 = vadd.f32 %v912_v32, %v865_v4 }
 0x108   :  { %v676_v5 = vmul.f32 %v627_v39, %v235_v58  ;;  %v723_v8 = vadd.f32 %v674_v16, %v574_v30  ;;  %v774_v35 = vmul.f32 -1.953125e-05, %v235_v58  ;;  %v868_v43 = vmul.f32 %v819_v17, %v721_v48 }
 0x109   :  { %v821_v44 = vadd.f32 -3.9859694e-07, %v772_v52  ;;  %v914_v59 = vadd.f32 %v913_v10, %v866_v0  ;;  %v724_v36 = vadd.f32 %v675_v63, %v576_v56  ;;  %v822_v13 = vadd.f32 -3.9859694e-07, %v773_v28 }
 0x10a   :  { %v869_v50 = vmul.f32 %v820_v22, %v722_v19  ;;  %v725_v33 = vadd.f32 %v676_v5, %v578_v51  ;;  %v823_v12 = vadd.f32 -3.9859694e-07, %v774_v35 }
 0x10b   :  { %v915_v21 = vadd.f32 %v914_v59, %v867_v27  ;;  %v870_v34 = vmul.f32 %v821_v44, %v723_v8  ;;  %v871_v37 = vmul.f32 %v822_v13, %v724_v36 }
 0x10c   :  { %v872_v11 = vmul.f32 %v823_v12, %v725_v33 }
 0x10d   :  { %v916_v14 = vadd.f32 %v915_v21, %v868_v43 }
 0x10f   :  { %v917_v1 = vadd.f32 %v916_v14, %v869_v50 }
 0x111   :  { %v918_v25 = vadd.f32 %v917_v1, %v870_v34 }
 0x113   :  { %v919_v60 = vadd.f32 %v918_v25, %v871_v37 }
 0x115   :  { %v920_v57 = vadd.f32 %v919_v60, %v872_v11 }
 0x117   :  { %921 = vadd.xlane.f32.xlu0 %v920_v57 }
 0x1a4   :  { %v922_v30 = vpop.xlane.xlu0 %921 }
 0x1a5   :  { %v923_v2 = vrot.slane %v922_v30, 4 }
 0x1a7   :  { %v924_v20 = vadd.f32 %v923_v2, %v922_v30 }
 0x1a9   :  { %v925_v31 = vrot.slane %v924_v20, 2 }
 0x1ab   :  { %v926_v53 = vadd.f32 %v925_v31, %v924_v20 }
 0x1ad   :  { %v927_v56 = vrot.slane %v926_v53, 1 }
 0x1af   :  { %v928_v6 = vadd.f32 %v927_v56, %v926_v53 }
 0x1b1   :  { %1185 = vpush %v928_v6 }
 0x1e2   :  { %s1186_s1 = spop %1185 }
 0x1e3   :  { %931 = sst [smem:[#allocation7]] %s1186_s1 }
 0x1e4   :  { %1441 = shalt.err (!%p1438_p4)
}
 0x1e5   :  { %s1452_s13 = smov [#allocation7]  }
 0x1e6   :  { %939 = dma.smem_to_hbm %s1452_s13, 16, %s2822_s2, [#allocation4]  }
 0x1e7   :  { %1446 = dma.done.wait [#allocation4], 16  }
 0x1e8   :  { %1447 = vsyncadd [#allocation4], 4294967280 }
 0x1e9   :  { %943 = sfence }
 0x1ea   :  { %944 = vsyncpa [#allocation3], 1 }
 0x1eb   :  { %945 = vsyncpa [#allocation6], 1 }
 0x1ec   :  { %946 = vsyncpa [#allocation4], 1 }

</bundles_post_ra>
